<compile_context>
chip_gen: v7x
topology: tpu7x:2x2x1
jax: 0.10.0
libtpu: 0.0.40
codegen_flags: <defaults>
</compile_context>

<pallas_src>
import jax
import jax.numpy as jnp
import numpy as np
from jax.experimental import pallas as pl
from jax.experimental.pallas import tpu as pltpu


def _conv3x3_mxu(taps, w_ref, rows_out, W, Cp):
    """One 3x3 conv (stride 1, pad 1 in W) as 9 accumulating MXU matmuls.

    taps    : list of 3 bf16 (rows_out * W, Cp) operands, one per dy tap
              (already include the row halo / row zero-padding).
    w_ref   : (3, 3, Cp, Cp) weight ref, indexed [dy, dx].
    returns : f32 (rows_out * W, Cp).
    """
    M = rows_out * W

    def acc_dx(dx):
        a = jnp.dot(taps[0], w_ref[0, dx], preferred_element_type=jnp.float32)
        a = a + jnp.dot(taps[1], w_ref[1, dx], preferred_element_type=jnp.float32)
        a = a + jnp.dot(taps[2], w_ref[2, dx], preferred_element_type=jnp.float32)
        return a

    center = acc_dx(1)   # dx = 1: no shift
    left = acc_dx(0)     # dx = 0: out[:, x] += left[:, x - 1]
    right = acc_dx(2)    # dx = 2: out[:, x] += right[:, x + 1]

    # Column index of every flattened (row*W + x) position, for edge masking.
    idx = jax.lax.broadcasted_iota(jnp.int32, (M, Cp), 0)
    if W & (W - 1) == 0:                       # static: W is a power of two
        col = jax.lax.bitwise_and(idx, W - 1)
    else:
        col = jax.lax.rem(idx, W)

    # Shift by +/-1 along the flattened row-major axis with pltpu.roll (XLU).
    # The single wrapped element per image row lands exactly in the width
    # zero-padding column, which we mask to zero.
    left_sh = pltpu.roll(left, shift=1, axis=0)
    left_sh = jnp.where(col == 0, 0.0, left_sh)
    right_sh = pltpu.roll(right, shift=M - 1, axis=0)   # == shift by -1
    right_sh = jnp.where(col == W - 1, 0.0, right_sh)

    return center + left_sh + right_sh


def basic_block_kernel(x_ref, w1_ref, w2_ref, sb_ref, out_ref, h1_ref):
    # x_ref  : (1, H+4, W, Cp) bf16  whole image, spatially pre-padded by 2
    #                                zero rows top/bottom, channels padded to
    #                                Cp.  Block constant over j -> resident.
    # w*_ref : (3, 3, Cp, Cp)  bf16  conv weights [dy, dx, ci, co].
    # sb_ref : (4, Cp)         f32   rows = [scale1, bias1, scale2, bias2].
    # out_ref: (1, TH, W, Cp)  bf16  output row tile.
    # h1_ref : (TH+2, W, Cp)   bf16  scratch: BN1+ReLU intermediate with one
    #                                halo row each side; fully rewritten
    #                                every step (no cross-step carry).
    W, Cp = x_ref.shape[2], x_ref.shape[3]
    TH = out_ref.shape[1]
    j = pl.program_id(1)
    nj = pl.num_programs(1)
    cdt = x_ref.dtype

    r0 = pl.multiple_of(j * TH, TH)   # first output row of this tile

    # ---- conv1 + BN1 + ReLU over TH+2 rows (one halo row each side) -------
    # Tap dy reads padded input rows [r0+dy, r0+dy+TH+2): a dynamic,
    # tile-aligned leading-axis slice of the resident image (no copy).
    taps1 = [x_ref[0, pl.ds(r0 + dy, TH + 2)].reshape((TH + 2) * W, Cp)
             for dy in range(3)]
    c1 = _conv3x3_mxu(taps1, w1_ref, TH + 2, W, Cp)
    h1 = jnp.maximum(c1 * sb_ref[0:1, :] + sb_ref[1:2, :], 0.0)
    h1_ref[...] = h1.astype(cdt).reshape(TH + 2, W, Cp)

    # Halo rows that fall outside the image are conv2's zero padding (true
    # zeros, not BN1/ReLU of padding rows) -> overwrite them.
    @pl.when(j == 0)
    def _():
        h1_ref[0:1] = jnp.zeros((1, W, Cp), cdt)

    @pl.when(j == nj - 1)
    def _():
        h1_ref[TH + 1:TH + 2] = jnp.zeros((1, W, Cp), cdt)

    # ---- conv2 + BN2 -------------------------------------------------------
    taps2 = [h1_ref[dy:dy + TH].reshape(TH * W, Cp) for dy in range(3)]
    c2 = _conv3x3_mxu(taps2, w2_ref, TH, W, Cp)
    h2 = c2 * sb_ref[2:3, :] + sb_ref[3:4, :]

    # identity residual (stride=1, downsample=None) + final ReLU
    res = x_ref[0, pl.ds(r0 + 2, TH)].reshape(TH * W, Cp).astype(jnp.float32)
    out_ref[0] = jnp.maximum(h2 + res, 0.0).astype(out_ref.dtype).reshape(TH, W, Cp)


def _round_up(x, m):
    return (x + m - 1) // m * m


def _pick_row_tile(H, row_tile):
    if row_tile is not None:
        assert H % row_tile == 0, f"row_tile={row_tile} must divide H={H}"
        return row_tile
    # Largest divisor of H that is <= 32: amortizes per-step overhead and
    # keeps the 2-row conv1 halo recompute small (review item).
    for t in range(min(H, 32), 0, -1):
        if H % t == 0:
            return t
    return H


def basic_block_pallas(x_nchw, w1, w2, bn1, bn2, eps=1e-5, row_tile=None,
                       compute_dtype=jnp.bfloat16):
    """x_nchw: (N, C, H, W) f32. w1/w2: (3,3,Cin,Cout) HWIO.
    bn1/bn2: dict with gamma, beta, mean, var (each shape (C,))."""
    N, C, H, W = x_nchw.shape
    Cout = w1.shape[-1]
    assert C == Cout, "identity residual requires inplanes == planes"
    assert W % 8 == 0, "fast path assumes sublane-aligned width (W % 8 == 0)"

    Cp = _round_up(C, 128)                   # lane-dense channel padding
    TH = _pick_row_tile(H, row_tile)         # output rows per grid step
    nj = H // TH

    # NCHW -> NHWC, bf16 cast, channel pad to Cp, and a 2-row spatial zero pad
    # top/bottom — all fused by XLA into one HBM pass.  The spatial pad makes
    # every conv1 row tap an in-range slice of the resident image, so no
    # padded copy is ever built in VMEM and the row-tile axis has no carry.
    x = jnp.transpose(x_nchw, (0, 2, 3, 1)).astype(compute_dtype)
    x = jnp.pad(x, ((0, 0), (2, 2), (0, 0), (0, Cp - C)))

    def prep_w(w):  # (3,3,Cin,Cout) HWIO -> (3,3,Cp,Cp) bf16
        return jnp.pad(w.astype(compute_dtype),
                       ((0, 0), (0, 0), (0, Cp - C), (0, Cp - Cout)))

    def fold(bn):   # inference-mode BN folded to per-channel scale / bias
        inv = bn['gamma'] / jnp.sqrt(bn['var'] + eps)
        return (jnp.pad(inv, (0, Cp - C)),
                jnp.pad(bn['beta'] - bn['mean'] * inv, (0, Cp - C)))

    s1, b1 = fold(bn1)
    s2, b2 = fold(bn2)
    sb = jnp.stack([s1, b1, s2, b2]).astype(jnp.float32)   # (4, Cp)

    out_nhwc = pl.pallas_call(
        basic_block_kernel,
        out_shape=jax.ShapeDtypeStruct((N, H, W, Cp), compute_dtype),
        grid_spec=pltpu.PrefetchScalarGridSpec(
            num_scalar_prefetch=0,
            grid=(N, nj),
            in_specs=[
                # whole (pre-padded) image per batch element; constant in j so
                # it is DMA'd once per image and reused by every row tile.
                pl.BlockSpec((1, H + 4, W, Cp), lambda n, j: (n, 0, 0, 0)),
                pl.BlockSpec((3, 3, Cp, Cp), lambda n, j: (0, 0, 0, 0)),
                pl.BlockSpec((3, 3, Cp, Cp), lambda n, j: (0, 0, 0, 0)),
                pl.BlockSpec((4, Cp), lambda n, j: (0, 0)),
            ],
            out_specs=pl.BlockSpec((1, TH, W, Cp), lambda n, j: (n, j, 0, 0)),
            scratch_shapes=[
                pltpu.VMEM((TH + 2, W, Cp), compute_dtype),  # conv1 interm.
            ],
        ),
        compiler_params=pltpu.CompilerParams(
            # No cross-step scratch dependency remains -> both axes parallel
            # (v7x can split row tiles across its two TensorCores at batch 1).
            dimension_semantics=("parallel", "parallel"),
            vmem_limit_bytes=32 * 1024 * 1024,
        ),
    )(x, prep_w(w1), prep_w(w2), sb)

    # NOTE: when chaining blocks, keep the bf16 NHWC Cp-padded layout between
    # blocks; the slice / f32 cast / NCHW transpose below is demo-only.
    return jnp.transpose(out_nhwc[:, :, :, :C].astype(jnp.float32), (0, 3, 1, 2))


def basic_block_ref(x_nchw, w1, w2, bn1, bn2, eps=1e-5):
    """Pure-JAX f32 reference (same math), for correctness check."""
    x = jnp.transpose(x_nchw, (0, 2, 3, 1)).astype(jnp.float32)
    dn = jax.lax.conv_dimension_numbers(x.shape, w1.shape,
                                        ('NHWC', 'HWIO', 'NHWC'))

    def conv(h, w):
        return jax.lax.conv_general_dilated(h, w, (1, 1), ((1, 1), (1, 1)),
                                            dimension_numbers=dn)

    def bn(h, p):
        inv = p['gamma'] / jnp.sqrt(p['var'] + eps)
        return h * inv + (p['beta'] - p['mean'] * inv)

    out = jax.nn.relu(bn(conv(x, w1), bn1))
    out = bn(conv(out, w2), bn2)
    out = jax.nn.relu(out + x)
    return jnp.transpose(out, (0, 3, 1, 2))


if __name__ == "__main__":
    N, C, H, W = 2, 4, 16, 16  # inplanes == planes == 4, stride=1, downsample=None
    key = jax.random.PRNGKey(0)
    ks = jax.random.split(key, 10)

    x = jax.random.normal(ks[0], (N, C, H, W), jnp.float32)
    # conv weights in HWIO (equivalent to PyTorch (Cout, Cin, 3, 3) transposed)
    w1 = jax.random.normal(ks[1], (3, 3, C, C), jnp.float32) * 0.1
    w2 = jax.random.normal(ks[2], (3, 3, C, C), jnp.float32) * 0.1
    bn1 = dict(gamma=jax.random.uniform(ks[3], (C,), minval=0.5, maxval=1.5),
               beta=jax.random.normal(ks[4], (C,)) * 0.1,
               mean=jax.random.normal(ks[5], (C,)) * 0.1,
               var=jax.random.uniform(ks[6], (C,), minval=0.5, maxval=1.5))
    bn2 = dict(gamma=jax.random.uniform(ks[7], (C,), minval=0.5, maxval=1.5),
               beta=jax.random.normal(ks[8], (C,)) * 0.1,
               mean=jnp.zeros((C,), jnp.float32),
               var=jnp.ones((C,), jnp.float32))

    out = jax.block_until_ready(
        basic_block_pallas(x, w1, w2, bn1, bn2, row_tile=8))
    ref = jax.block_until_ready(basic_block_ref(x, w1, w2, bn1, bn2))

    # tolerance relaxed: bf16 MXU operands, bf16 intermediate and bf16 output
    # (deliberate inference-mode choice).
    np.testing.assert_allclose(np.asarray(out), np.asarray(ref),
                               rtol=5e-2, atol=5e-2)
    print("KERNEL_OK")
</pallas_src>

<mosaic_0001>
module attributes {stable_mosaic.version = 11 : i64} {
  func.func @basic_block_kernel(%arg0: i32, %arg1: i32, %arg2: memref<1x20x16x128xbf16, #tpu.memory_space<vmem>>, %arg3: memref<3x3x128x128xbf16, #tpu.memory_space<vmem>>, %arg4: memref<3x3x128x128xbf16, #tpu.memory_space<vmem>>, %arg5: memref<4x128xf32, #tpu.memory_space<vmem>>, %arg6: memref<1x8x16x128xbf16, #tpu.memory_space<vmem>>, %arg7: memref<10x16x128xbf16, #tpu.memory_space<vmem>>) attributes {dimension_semantics = [#tpu.dimension_semantics<parallel>, #tpu.dimension_semantics<parallel>], iteration_bounds = array<i64: 2, 2>, scalar_prefetch = 0 : i64, scratch_operands = 1 : i64, tpu.core_type = #tpu.core_type<tc>, window_params = [{transform_indices = @transform_0, window_bounds = array<i64: 1, 20, 16, 128>}, {pipeline_mode = #tpu.pipeline_mode<synchronous>, transform_indices = @transform_1, window_bounds = array<i64: 3, 3, 128, 128>}, {pipeline_mode = #tpu.pipeline_mode<synchronous>, transform_indices = @transform_2, window_bounds = array<i64: 3, 3, 128, 128>}, {pipeline_mode = #tpu.pipeline_mode<synchronous>, transform_indices = @transform_3, window_bounds = array<i64: 4, 128>}, {transform_indices = @transform_4, window_bounds = array<i64: 1, 8, 16, 128>}]} {
    %c8_i32 = arith.constant 8 : i32
    %0 = arith.muli %arg1, %c8_i32 : i32
    %1 = tpu.assume_multiple %0, 8 : i32
    %c0_i32 = arith.constant 0 : i32
    %2 = arith.addi %1, %c0_i32 : i32
    %c0 = arith.constant 0 : index
    %3 = arith.index_cast %2 : i32 to index
    %c0_0 = arith.constant 0 : index
    %c0_1 = arith.constant 0 : index
    %4 = vector.load %arg2[%c0, %3, %c0_0, %c0_1] : memref<1x20x16x128xbf16, #tpu.memory_space<vmem>>, vector<1x10x16x128xbf16>
    %5 = vector.shape_cast %4 : vector<1x10x16x128xbf16> to vector<10x16x128xbf16>
    %6 = vector.shape_cast %5 : vector<10x16x128xbf16> to vector<160x128xbf16>
    %c1_i32 = arith.constant 1 : i32
    %7 = arith.addi %1, %c1_i32 : i32
    %c0_2 = arith.constant 0 : index
    %8 = arith.index_cast %7 : i32 to index
    %c0_3 = arith.constant 0 : index
    %c0_4 = arith.constant 0 : index
    %9 = vector.load %arg2[%c0_2, %8, %c0_3, %c0_4] : memref<1x20x16x128xbf16, #tpu.memory_space<vmem>>, vector<1x10x16x128xbf16>
    %10 = vector.shape_cast %9 : vector<1x10x16x128xbf16> to vector<10x16x128xbf16>
    %11 = vector.shape_cast %10 : vector<10x16x128xbf16> to vector<160x128xbf16>
    %c2_i32 = arith.constant 2 : i32
    %12 = arith.addi %1, %c2_i32 : i32
    %c0_5 = arith.constant 0 : index
    %13 = arith.index_cast %12 : i32 to index
    %c0_6 = arith.constant 0 : index
    %c0_7 = arith.constant 0 : index
    %14 = vector.load %arg2[%c0_5, %13, %c0_6, %c0_7] : memref<1x20x16x128xbf16, #tpu.memory_space<vmem>>, vector<1x10x16x128xbf16>
    %15 = vector.shape_cast %14 : vector<1x10x16x128xbf16> to vector<10x16x128xbf16>
    %16 = vector.shape_cast %15 : vector<10x16x128xbf16> to vector<160x128xbf16>
    %c0_8 = arith.constant 0 : index
    %c1 = arith.constant 1 : index
    %c0_9 = arith.constant 0 : index
    %c0_10 = arith.constant 0 : index
    %17 = vector.load %arg3[%c0_8, %c1, %c0_9, %c0_10] : memref<3x3x128x128xbf16, #tpu.memory_space<vmem>>, vector<1x1x128x128xbf16>
    %18 = vector.shape_cast %17 : vector<1x1x128x128xbf16> to vector<128x128xbf16>
    %cst = arith.constant dense<0.000000e+00> : vector<160x128xf32>
    %19 = tpu.matmul %6, %18, %cst {dimension_numbers = #tpu.dot_dimension_numbers<[1], [0], [0], [1], [0, 0, 1, 1], [], []>} : vector<160x128xbf16>, vector<128x128xbf16>, vector<160x128xf32> -> vector<160x128xf32>
    %c1_11 = arith.constant 1 : index
    %c1_12 = arith.constant 1 : index
    %c0_13 = arith.constant 0 : index
    %c0_14 = arith.constant 0 : index
    %20 = vector.load %arg3[%c1_11, %c1_12, %c0_13, %c0_14] : memref<3x3x128x128xbf16, #tpu.memory_space<vmem>>, vector<1x1x128x128xbf16>
    %21 = vector.shape_cast %20 : vector<1x1x128x128xbf16> to vector<128x128xbf16>
    %cst_15 = arith.constant dense<0.000000e+00> : vector<160x128xf32>
    %22 = tpu.matmul %11, %21, %cst_15 {dimension_numbers = #tpu.dot_dimension_numbers<[1], [0], [0], [1], [0, 0, 1, 1], [], []>} : vector<160x128xbf16>, vector<128x128xbf16>, vector<160x128xf32> -> vector<160x128xf32>
    %23 = arith.addf %19, %22 : vector<160x128xf32>
    %c2 = arith.constant 2 : index
    %c1_16 = arith.constant 1 : index
    %c0_17 = arith.constant 0 : index
    %c0_18 = arith.constant 0 : index
    %24 = vector.load %arg3[%c2, %c1_16, %c0_17, %c0_18] : memref<3x3x128x128xbf16, #tpu.memory_space<vmem>>, vector<1x1x128x128xbf16>
    %25 = vector.shape_cast %24 : vector<1x1x128x128xbf16> to vector<128x128xbf16>
    %cst_19 = arith.constant dense<0.000000e+00> : vector<160x128xf32>
    %26 = tpu.matmul %16, %25, %cst_19 {dimension_numbers = #tpu.dot_dimension_numbers<[1], [0], [0], [1], [0, 0, 1, 1], [], []>} : vector<160x128xbf16>, vector<128x128xbf16>, vector<160x128xf32> -> vector<160x128xf32>
    %27 = arith.addf %23, %26 : vector<160x128xf32>
    %c0_20 = arith.constant 0 : index
    %c0_21 = arith.constant 0 : index
    %c0_22 = arith.constant 0 : index
    %c0_23 = arith.constant 0 : index
    %28 = vector.load %arg3[%c0_20, %c0_21, %c0_22, %c0_23] : memref<3x3x128x128xbf16, #tpu.memory_space<vmem>>, vector<1x1x128x128xbf16>
    %29 = vector.shape_cast %28 : vector<1x1x128x128xbf16> to vector<128x128xbf16>
    %cst_24 = arith.constant dense<0.000000e+00> : vector<160x128xf32>
    %30 = tpu.matmul %6, %29, %cst_24 {dimension_numbers = #tpu.dot_dimension_numbers<[1], [0], [0], [1], [0, 0, 1, 1], [], []>} : vector<160x128xbf16>, vector<128x128xbf16>, vector<160x128xf32> -> vector<160x128xf32>
    %c1_25 = arith.constant 1 : index
    %c0_26 = arith.constant 0 : index
    %c0_27 = arith.constant 0 : index
    %c0_28 = arith.constant 0 : index
    %31 = vector.load %arg3[%c1_25, %c0_26, %c0_27, %c0_28] : memref<3x3x128x128xbf16, #tpu.memory_space<vmem>>, vector<1x1x128x128xbf16>
    %32 = vector.shape_cast %31 : vector<1x1x128x128xbf16> to vector<128x128xbf16>
    %cst_29 = arith.constant dense<0.000000e+00> : vector<160x128xf32>
    %33 = tpu.matmul %11, %32, %cst_29 {dimension_numbers = #tpu.dot_dimension_numbers<[1], [0], [0], [1], [0, 0, 1, 1], [], []>} : vector<160x128xbf16>, vector<128x128xbf16>, vector<160x128xf32> -> vector<160x128xf32>
    %34 = arith.addf %30, %33 : vector<160x128xf32>
    %c2_30 = arith.constant 2 : index
    %c0_31 = arith.constant 0 : index
    %c0_32 = arith.constant 0 : index
    %c0_33 = arith.constant 0 : index
    %35 = vector.load %arg3[%c2_30, %c0_31, %c0_32, %c0_33] : memref<3x3x128x128xbf16, #tpu.memory_space<vmem>>, vector<1x1x128x128xbf16>
    %36 = vector.shape_cast %35 : vector<1x1x128x128xbf16> to vector<128x128xbf16>
    %cst_34 = arith.constant dense<0.000000e+00> : vector<160x128xf32>
    %37 = tpu.matmul %16, %36, %cst_34 {dimension_numbers = #tpu.dot_dimension_numbers<[1], [0], [0], [1], [0, 0, 1, 1], [], []>} : vector<160x128xbf16>, vector<128x128xbf16>, vector<160x128xf32> -> vector<160x128xf32>
    %38 = arith.addf %34, %37 : vector<160x128xf32>
    %c0_35 = arith.constant 0 : index
    %c2_36 = arith.constant 2 : index
    %c0_37 = arith.constant 0 : index
    %c0_38 = arith.constant 0 : index
    %39 = vector.load %arg3[%c0_35, %c2_36, %c0_37, %c0_38] : memref<3x3x128x128xbf16, #tpu.memory_space<vmem>>, vector<1x1x128x128xbf16>
    %40 = vector.shape_cast %39 : vector<1x1x128x128xbf16> to vector<128x128xbf16>
    %cst_39 = arith.constant dense<0.000000e+00> : vector<160x128xf32>
    %41 = tpu.matmul %6, %40, %cst_39 {dimension_numbers = #tpu.dot_dimension_numbers<[1], [0], [0], [1], [0, 0, 1, 1], [], []>} : vector<160x128xbf16>, vector<128x128xbf16>, vector<160x128xf32> -> vector<160x128xf32>
    %c1_40 = arith.constant 1 : index
    %c2_41 = arith.constant 2 : index
    %c0_42 = arith.constant 0 : index
    %c0_43 = arith.constant 0 : index
    %42 = vector.load %arg3[%c1_40, %c2_41, %c0_42, %c0_43] : memref<3x3x128x128xbf16, #tpu.memory_space<vmem>>, vector<1x1x128x128xbf16>
    %43 = vector.shape_cast %42 : vector<1x1x128x128xbf16> to vector<128x128xbf16>
    %cst_44 = arith.constant dense<0.000000e+00> : vector<160x128xf32>
    %44 = tpu.matmul %11, %43, %cst_44 {dimension_numbers = #tpu.dot_dimension_numbers<[1], [0], [0], [1], [0, 0, 1, 1], [], []>} : vector<160x128xbf16>, vector<128x128xbf16>, vector<160x128xf32> -> vector<160x128xf32>
    %45 = arith.addf %41, %44 : vector<160x128xf32>
    %c2_45 = arith.constant 2 : index
    %c2_46 = arith.constant 2 : index
    %c0_47 = arith.constant 0 : index
    %c0_48 = arith.constant 0 : index
    %46 = vector.load %arg3[%c2_45, %c2_46, %c0_47, %c0_48] : memref<3x3x128x128xbf16, #tpu.memory_space<vmem>>, vector<1x1x128x128xbf16>
    %47 = vector.shape_cast %46 : vector<1x1x128x128xbf16> to vector<128x128xbf16>
    %cst_49 = arith.constant dense<0.000000e+00> : vector<160x128xf32>
    %48 = tpu.matmul %16, %47, %cst_49 {dimension_numbers = #tpu.dot_dimension_numbers<[1], [0], [0], [1], [0, 0, 1, 1], [], []>} : vector<160x128xbf16>, vector<128x128xbf16>, vector<160x128xf32> -> vector<160x128xf32>
    %49 = arith.addf %45, %48 : vector<160x128xf32>
    %50 = tpu.iota {dimensions = array<i32: 0>} : vector<160x128xi32>
    %c15_i32 = arith.constant 15 : i32
    %51 = vector.broadcast %c15_i32 : i32 to vector<160x128xi32>
    %52 = arith.andi %50, %51 : vector<160x128xi32>
    %c1_i32_50 = arith.constant 1 : i32
    %53 = tpu.dynamic_rotate %38 by %c1_i32_50 dim 0 : vector<160x128xf32>, i32 -> vector<160x128xf32>
    %c0_i32_51 = arith.constant 0 : i32
    %54 = vector.broadcast %c0_i32_51 : i32 to vector<160x128xi32>
    %55 = arith.cmpi eq, %52, %54 : vector<160x128xi32>
    %cst_52 = arith.constant 0.000000e+00 : f32
    %56 = vector.broadcast %cst_52 : f32 to vector<160x128xf32>
    %57 = arith.select %55, %56, %53 : vector<160x128xi1>, vector<160x128xf32>
    %c159_i32 = arith.constant 159 : i32
    %58 = tpu.dynamic_rotate %49 by %c159_i32 dim 0 : vector<160x128xf32>, i32 -> vector<160x128xf32>
    %c15_i32_53 = arith.constant 15 : i32
    %59 = vector.broadcast %c15_i32_53 : i32 to vector<160x128xi32>
    %60 = arith.cmpi eq, %52, %59 : vector<160x128xi32>
    %cst_54 = arith.constant 0.000000e+00 : f32
    %61 = vector.broadcast %cst_54 : f32 to vector<160x128xf32>
    %62 = arith.select %60, %61, %58 : vector<160x128xi1>, vector<160x128xf32>
    %63 = arith.addf %27, %57 : vector<160x128xf32>
    %64 = arith.addf %63, %62 : vector<160x128xf32>
    %c0_55 = arith.constant 0 : index
    %c0_56 = arith.constant 0 : index
    %65 = vector.load %arg5[%c0_55, %c0_56] : memref<4x128xf32, #tpu.memory_space<vmem>>, vector<1x128xf32>
    %66 = vector.broadcast %65 : vector<1x128xf32> to vector<160x128xf32>
    %67 = arith.mulf %64, %66 : vector<160x128xf32>
    %c1_57 = arith.constant 1 : index
    %c0_58 = arith.constant 0 : index
    %68 = vector.load %arg5[%c1_57, %c0_58] : memref<4x128xf32, #tpu.memory_space<vmem>>, vector<1x128xf32>
    %69 = vector.broadcast %68 : vector<1x128xf32> to vector<160x128xf32>
    %70 = arith.addf %67, %69 : vector<160x128xf32>
    %cst_59 = arith.constant 0.000000e+00 : f32
    %71 = vector.broadcast %cst_59 : f32 to vector<160x128xf32>
    %72 = arith.maximumf %70, %71 : vector<160x128xf32>
    %73 = arith.truncf %72 : vector<160x128xf32> to vector<160x128xbf16>
    %74 = vector.shape_cast %73 : vector<160x128xbf16> to vector<10x16x128xbf16>
    %c0_60 = arith.constant 0 : index
    %c0_61 = arith.constant 0 : index
    %c0_62 = arith.constant 0 : index
    %75 = vector.load %arg7[%c0_60, %c0_61, %c0_62] : memref<10x16x128xbf16, #tpu.memory_space<vmem>>, vector<10x16x128xbf16>
    tpu.vector_store %arg7[%c0_60, %c0_61, %c0_62], %74 {strides = array<i32>} : memref<10x16x128xbf16, #tpu.memory_space<vmem>>, vector<10x16x128xbf16>,
    %c0_i32_63 = arith.constant 0 : i32
    %76 = arith.cmpi eq, %arg1, %c0_i32_63 : i32
    %77 = arith.extui %76 : i1 to i32
    %c0_i32_64 = arith.constant 0 : i32
    %78 = arith.cmpi ne, %77, %c0_i32_64 : i32
    scf.if %78 {
      %cst_139 = arith.constant 0.000000e+00 : bf16
      %156 = vector.broadcast %cst_139 : bf16 to vector<1x16x128xbf16>
      %c0_140 = arith.constant 0 : index
      %c0_141 = arith.constant 0 : index
      %c0_142 = arith.constant 0 : index
      %157 = vector.load %arg7[%c0_140, %c0_141, %c0_142] : memref<10x16x128xbf16, #tpu.memory_space<vmem>>, vector<1x16x128xbf16>
      tpu.vector_store %arg7[%c0_140, %c0_141, %c0_142], %156 {strides = array<i32>} : memref<10x16x128xbf16, #tpu.memory_space<vmem>>, vector<1x16x128xbf16>,
    } else {
    }
    %c1_i32_65 = arith.constant 1 : i32
    %79 = arith.cmpi eq, %arg1, %c1_i32_65 : i32
    %80 = arith.extui %79 : i1 to i32
    %c0_i32_66 = arith.constant 0 : i32
    %81 = arith.cmpi ne, %80, %c0_i32_66 : i32
    scf.if %81 {
      %cst_139 = arith.constant 0.000000e+00 : bf16
      %156 = vector.broadcast %cst_139 : bf16 to vector<1x16x128xbf16>
      %c9 = arith.constant 9 : index
      %c0_140 = arith.constant 0 : index
      %c0_141 = arith.constant 0 : index
      %157 = vector.load %arg7[%c9, %c0_140, %c0_141] : memref<10x16x128xbf16, #tpu.memory_space<vmem>>, vector<1x16x128xbf16>
      tpu.vector_store %arg7[%c9, %c0_140, %c0_141], %156 {strides = array<i32>} : memref<10x16x128xbf16, #tpu.memory_space<vmem>>, vector<1x16x128xbf16>,
    } else {
    }
    %c0_67 = arith.constant 0 : index
    %c0_68 = arith.constant 0 : index
    %c0_69 = arith.constant 0 : index
    %82 = vector.load %arg7[%c0_67, %c0_68, %c0_69] : memref<10x16x128xbf16, #tpu.memory_space<vmem>>, vector<8x16x128xbf16>
    %83 = vector.shape_cast %82 : vector<8x16x128xbf16> to vector<128x128xbf16>
    %c1_70 = arith.constant 1 : index
    %c0_71 = arith.constant 0 : index
    %c0_72 = arith.constant 0 : index
    %84 = vector.load %arg7[%c1_70, %c0_71, %c0_72] : memref<10x16x128xbf16, #tpu.memory_space<vmem>>, vector<8x16x128xbf16>
    %85 = vector.shape_cast %84 : vector<8x16x128xbf16> to vector<128x128xbf16>
    %c2_73 = arith.constant 2 : index
    %c0_74 = arith.constant 0 : index
    %c0_75 = arith.constant 0 : index
    %86 = vector.load %arg7[%c2_73, %c0_74, %c0_75] : memref<10x16x128xbf16, #tpu.memory_space<vmem>>, vector<8x16x128xbf16>
    %87 = vector.shape_cast %86 : vector<8x16x128xbf16> to vector<128x128xbf16>
    %c0_76 = arith.constant 0 : index
    %c1_77 = arith.constant 1 : index
    %c0_78 = arith.constant 0 : index
    %c0_79 = arith.constant 0 : index
    %88 = vector.load %arg4[%c0_76, %c1_77, %c0_78, %c0_79] : memref<3x3x128x128xbf16, #tpu.memory_space<vmem>>, vector<1x1x128x128xbf16>
    %89 = vector.shape_cast %88 : vector<1x1x128x128xbf16> to vector<128x128xbf16>
    %cst_80 = arith.constant dense<0.000000e+00> : vector<128x128xf32>
    %90 = tpu.matmul %83, %89, %cst_80 {dimension_numbers = #tpu.dot_dimension_numbers<[1], [0], [0], [1], [0, 0, 1, 1], [], []>} : vector<128x128xbf16>, vector<128x128xbf16>, vector<128x128xf32> -> vector<128x128xf32>
    %c1_81 = arith.constant 1 : index
    %c1_82 = arith.constant 1 : index
    %c0_83 = arith.constant 0 : index
    %c0_84 = arith.constant 0 : index
    %91 = vector.load %arg4[%c1_81, %c1_82, %c0_83, %c0_84] : memref<3x3x128x128xbf16, #tpu.memory_space<vmem>>, vector<1x1x128x128xbf16>
    %92 = vector.shape_cast %91 : vector<1x1x128x128xbf16> to vector<128x128xbf16>
    %cst_85 = arith.constant dense<0.000000e+00> : vector<128x128xf32>
    %93 = tpu.matmul %85, %92, %cst_85 {dimension_numbers = #tpu.dot_dimension_numbers<[1], [0], [0], [1], [0, 0, 1, 1], [], []>} : vector<128x128xbf16>, vector<128x128xbf16>, vector<128x128xf32> -> vector<128x128xf32>
    %94 = arith.addf %90, %93 : vector<128x128xf32>
    %c2_86 = arith.constant 2 : index
    %c1_87 = arith.constant 1 : index
    %c0_88 = arith.constant 0 : index
    %c0_89 = arith.constant 0 : index
    %95 = vector.load %arg4[%c2_86, %c1_87, %c0_88, %c0_89] : memref<3x3x128x128xbf16, #tpu.memory_space<vmem>>, vector<1x1x128x128xbf16>
    %96 = vector.shape_cast %95 : vector<1x1x128x128xbf16> to vector<128x128xbf16>
    %cst_90 = arith.constant dense<0.000000e+00> : vector<128x128xf32>
    %97 = tpu.matmul %87, %96, %cst_90 {dimension_numbers = #tpu.dot_dimension_numbers<[1], [0], [0], [1], [0, 0, 1, 1], [], []>} : vector<128x128xbf16>, vector<128x128xbf16>, vector<128x128xf32> -> vector<128x128xf32>
    %98 = arith.addf %94, %97 : vector<128x128xf32>
    %c0_91 = arith.constant 0 : index
    %c0_92 = arith.constant 0 : index
    %c0_93 = arith.constant 0 : index
    %c0_94 = arith.constant 0 : index
    %99 = vector.load %arg4[%c0_91, %c0_92, %c0_93, %c0_94] : memref<3x3x128x128xbf16, #tpu.memory_space<vmem>>, vector<1x1x128x128xbf16>
    %100 = vector.shape_cast %99 : vector<1x1x128x128xbf16> to vector<128x128xbf16>
    %cst_95 = arith.constant dense<0.000000e+00> : vector<128x128xf32>
    %101 = tpu.matmul %83, %100, %cst_95 {dimension_numbers = #tpu.dot_dimension_numbers<[1], [0], [0], [1], [0, 0, 1, 1], [], []>} : vector<128x128xbf16>, vector<128x128xbf16>, vector<128x128xf32> -> vector<128x128xf32>
    %c1_96 = arith.constant 1 : index
    %c0_97 = arith.constant 0 : index
    %c0_98 = arith.constant 0 : index
    %c0_99 = arith.constant 0 : index
    %102 = vector.load %arg4[%c1_96, %c0_97, %c0_98, %c0_99] : memref<3x3x128x128xbf16, #tpu.memory_space<vmem>>, vector<1x1x128x128xbf16>
    %103 = vector.shape_cast %102 : vector<1x1x128x128xbf16> to vector<128x128xbf16>
    %cst_100 = arith.constant dense<0.000000e+00> : vector<128x128xf32>
    %104 = tpu.matmul %85, %103, %cst_100 {dimension_numbers = #tpu.dot_dimension_numbers<[1], [0], [0], [1], [0, 0, 1, 1], [], []>} : vector<128x128xbf16>, vector<128x128xbf16>, vector<128x128xf32> -> vector<128x128xf32>
    %105 = arith.addf %101, %104 : vector<128x128xf32>
    %c2_101 = arith.constant 2 : index
    %c0_102 = arith.constant 0 : index
    %c0_103 = arith.constant 0 : index
    %c0_104 = arith.constant 0 : index
    %106 = vector.load %arg4[%c2_101, %c0_102, %c0_103, %c0_104] : memref<3x3x128x128xbf16, #tpu.memory_space<vmem>>, vector<1x1x128x128xbf16>
    %107 = vector.shape_cast %106 : vector<1x1x128x128xbf16> to vector<128x128xbf16>
    %cst_105 = arith.constant dense<0.000000e+00> : vector<128x128xf32>
    %108 = tpu.matmul %87, %107, %cst_105 {dimension_numbers = #tpu.dot_dimension_numbers<[1], [0], [0], [1], [0, 0, 1, 1], [], []>} : vector<128x128xbf16>, vector<128x128xbf16>, vector<128x128xf32> -> vector<128x128xf32>
    %109 = arith.addf %105, %108 : vector<128x128xf32>
    %c0_106 = arith.constant 0 : index
    %c2_107 = arith.constant 2 : index
    %c0_108 = arith.constant 0 : index
    %c0_109 = arith.constant 0 : index
    %110 = vector.load %arg4[%c0_106, %c2_107, %c0_108, %c0_109] : memref<3x3x128x128xbf16, #tpu.memory_space<vmem>>, vector<1x1x128x128xbf16>
    %111 = vector.shape_cast %110 : vector<1x1x128x128xbf16> to vector<128x128xbf16>
    %cst_110 = arith.constant dense<0.000000e+00> : vector<128x128xf32>
    %112 = tpu.matmul %83, %111, %cst_110 {dimension_numbers = #tpu.dot_dimension_numbers<[1], [0], [0], [1], [0, 0, 1, 1], [], []>} : vector<128x128xbf16>, vector<128x128xbf16>, vector<128x128xf32> -> vector<128x128xf32>
    %c1_111 = arith.constant 1 : index
    %c2_112 = arith.constant 2 : index
    %c0_113 = arith.constant 0 : index
    %c0_114 = arith.constant 0 : index
    %113 = vector.load %arg4[%c1_111, %c2_112, %c0_113, %c0_114] : memref<3x3x128x128xbf16, #tpu.memory_space<vmem>>, vector<1x1x128x128xbf16>
    %114 = vector.shape_cast %113 : vector<1x1x128x128xbf16> to vector<128x128xbf16>
    %cst_115 = arith.constant dense<0.000000e+00> : vector<128x128xf32>
    %115 = tpu.matmul %85, %114, %cst_115 {dimension_numbers = #tpu.dot_dimension_numbers<[1], [0], [0], [1], [0, 0, 1, 1], [], []>} : vector<128x128xbf16>, vector<128x128xbf16>, vector<128x128xf32> -> vector<128x128xf32>
    %116 = arith.addf %112, %115 : vector<128x128xf32>
    %c2_116 = arith.constant 2 : index
    %c2_117 = arith.constant 2 : index
    %c0_118 = arith.constant 0 : index
    %c0_119 = arith.constant 0 : index
    %117 = vector.load %arg4[%c2_116, %c2_117, %c0_118, %c0_119] : memref<3x3x128x128xbf16, #tpu.memory_space<vmem>>, vector<1x1x128x128xbf16>
    %118 = vector.shape_cast %117 : vector<1x1x128x128xbf16> to vector<128x128xbf16>
    %cst_120 = arith.constant dense<0.000000e+00> : vector<128x128xf32>
    %119 = tpu.matmul %87, %118, %cst_120 {dimension_numbers = #tpu.dot_dimension_numbers<[1], [0], [0], [1], [0, 0, 1, 1], [], []>} : vector<128x128xbf16>, vector<128x128xbf16>, vector<128x128xf32> -> vector<128x128xf32>
    %120 = arith.addf %116, %119 : vector<128x128xf32>
    %121 = tpu.iota {dimensions = array<i32: 0>} : vector<128x128xi32>
    %c15_i32_121 = arith.constant 15 : i32
    %122 = vector.broadcast %c15_i32_121 : i32 to vector<128x128xi32>
    %123 = arith.andi %121, %122 : vector<128x128xi32>
    %c1_i32_122 = arith.constant 1 : i32
    %124 = tpu.dynamic_rotate %109 by %c1_i32_122 dim 0 : vector<128x128xf32>, i32 -> vector<128x128xf32>
    %c0_i32_123 = arith.constant 0 : i32
    %125 = vector.broadcast %c0_i32_123 : i32 to vector<128x128xi32>
    %126 = arith.cmpi eq, %123, %125 : vector<128x128xi32>
    %cst_124 = arith.constant 0.000000e+00 : f32
    %127 = vector.broadcast %cst_124 : f32 to vector<128x128xf32>
    %128 = arith.select %126, %127, %124 : vector<128x128xi1>, vector<128x128xf32>
    %c127_i32 = arith.constant 127 : i32
    %129 = tpu.dynamic_rotate %120 by %c127_i32 dim 0 : vector<128x128xf32>, i32 -> vector<128x128xf32>
    %c15_i32_125 = arith.constant 15 : i32
    %130 = vector.broadcast %c15_i32_125 : i32 to vector<128x128xi32>
    %131 = arith.cmpi eq, %123, %130 : vector<128x128xi32>
    %cst_126 = arith.constant 0.000000e+00 : f32
    %132 = vector.broadcast %cst_126 : f32 to vector<128x128xf32>
    %133 = arith.select %131, %132, %129 : vector<128x128xi1>, vector<128x128xf32>
    %134 = arith.addf %98, %128 : vector<128x128xf32>
    %135 = arith.addf %134, %133 : vector<128x128xf32>
    %c2_127 = arith.constant 2 : index
    %c0_128 = arith.constant 0 : index
    %136 = vector.load %arg5[%c2_127, %c0_128] : memref<4x128xf32, #tpu.memory_space<vmem>>, vector<1x128xf32>
    %137 = vector.broadcast %136 : vector<1x128xf32> to vector<128x128xf32>
    %138 = arith.mulf %135, %137 : vector<128x128xf32>
    %c3 = arith.constant 3 : index
    %c0_129 = arith.constant 0 : index
    %139 = vector.load %arg5[%c3, %c0_129] : memref<4x128xf32, #tpu.memory_space<vmem>>, vector<1x128xf32>
    %140 = vector.broadcast %139 : vector<1x128xf32> to vector<128x128xf32>
    %141 = arith.addf %138, %140 : vector<128x128xf32>
    %c2_i32_130 = arith.constant 2 : i32
    %142 = arith.addi %1, %c2_i32_130 : i32
    %c0_131 = arith.constant 0 : index
    %143 = arith.index_cast %142 : i32 to index
    %c0_132 = arith.constant 0 : index
    %c0_133 = arith.constant 0 : index
    %144 = vector.load %arg2[%c0_131, %143, %c0_132, %c0_133] : memref<1x20x16x128xbf16, #tpu.memory_space<vmem>>, vector<1x8x16x128xbf16>
    %145 = vector.shape_cast %144 : vector<1x8x16x128xbf16> to vector<8x16x128xbf16>
    %146 = vector.shape_cast %145 : vector<8x16x128xbf16> to vector<128x128xbf16>
    %147 = arith.extf %146 : vector<128x128xbf16> to vector<128x128xf32>
    %148 = arith.addf %141, %147 : vector<128x128xf32>
    %cst_134 = arith.constant 0.000000e+00 : f32
    %149 = vector.broadcast %cst_134 : f32 to vector<128x128xf32>
    %150 = arith.maximumf %148, %149 : vector<128x128xf32>
    %151 = arith.truncf %150 : vector<128x128xf32> to vector<128x128xbf16>
    %152 = vector.shape_cast %151 : vector<128x128xbf16> to vector<8x16x128xbf16>
    %c0_135 = arith.constant 0 : index
    %c0_136 = arith.constant 0 : index
    %c0_137 = arith.constant 0 : index
    %c0_138 = arith.constant 0 : index
    %153 = vector.load %arg6[%c0_135, %c0_136, %c0_137, %c0_138] : memref<1x8x16x128xbf16, #tpu.memory_space<vmem>>, vector<1x8x16x128xbf16>
    %154 = vector.shape_cast %153 : vector<1x8x16x128xbf16> to vector<8x16x128xbf16>
    %155 = vector.shape_cast %152 : vector<8x16x128xbf16> to vector<1x8x16x128xbf16>
    tpu.vector_store %arg6[%c0_135, %c0_136, %c0_137, %c0_138], %155 {strides = array<i32>} : memref<1x8x16x128xbf16, #tpu.memory_space<vmem>>, vector<1x8x16x128xbf16>,
    return
  }
  func.func @transform_0(%arg0: i32, %arg1: i32) -> (i32, i32, i32, i32) {
    %c0_i32 = arith.constant 0 : i32
    %c0_i32_0 = arith.constant 0 : i32
    %c0_i32_1 = arith.constant 0 : i32
    %c0_i32_2 = arith.constant 0 : i32
    return %arg0, %c0_i32, %c0_i32_0, %c0_i32_1 : i32, i32, i32, i32
  }
  func.func @transform_1(%arg0: i32, %arg1: i32) -> (i32, i32, i32, i32) {
    %c0_i32 = arith.constant 0 : i32
    %c0_i32_0 = arith.constant 0 : i32
    %c0_i32_1 = arith.constant 0 : i32
    %c0_i32_2 = arith.constant 0 : i32
    %c0_i32_3 = arith.constant 0 : i32
    return %c0_i32, %c0_i32_0, %c0_i32_1, %c0_i32_2 : i32, i32, i32, i32
  }
  func.func @transform_2(%arg0: i32, %arg1: i32) -> (i32, i32, i32, i32) {
    %c0_i32 = arith.constant 0 : i32
    %c0_i32_0 = arith.constant 0 : i32
    %c0_i32_1 = arith.constant 0 : i32
    %c0_i32_2 = arith.constant 0 : i32
    %c0_i32_3 = arith.constant 0 : i32
    return %c0_i32, %c0_i32_0, %c0_i32_1, %c0_i32_2 : i32, i32, i32, i32
  }
  func.func @transform_3(%arg0: i32, %arg1: i32) -> (i32, i32) {
    %c0_i32 = arith.constant 0 : i32
    %c0_i32_0 = arith.constant 0 : i32
    %c0_i32_1 = arith.constant 0 : i32
    return %c0_i32, %c0_i32_0 : i32, i32
  }
  func.func @transform_4(%arg0: i32, %arg1: i32) -> (i32, i32, i32, i32) {
    %c0_i32 = arith.constant 0 : i32
    %c0_i32_0 = arith.constant 0 : i32
    %c0_i32_1 = arith.constant 0 : i32
    return %arg0, %arg1, %c0_i32, %c0_i32_0 : i32, i32, i32, i32
  }
}

</mosaic_0001>

<bundles_post_ra>
// kernel: tpu_custom_call.1
= control target key start
LH: loop header
LB: loop body
LE: loop exit
PB: predicated region body
PF: predicated region fallthrough
CT: control target
= control target key end

     0   :  { %s7881_s0 = inlined_call_operand.hbm [shape: bf16[2,20,16,128], index: 0, kind: input, shape index: {}]   ;;  %s7882_s1 = inlined_call_operand.hbm [shape: bf16[3,3,128,128], index: 1, kind: input, shape index: {}]   ;;  %s7883_s2 = inlined_call_operand.hbm [shape: bf16[3,3,128,128], index: 2, kind: input, shape index: {}]   ;;  %s7884_s3 = inlined_call_operand.vmem [shape: f32[4,128], index: 3, kind: input, shape index: {}]   ;;  %s7885_s4 = inlined_call_operand.hbm [shape: bf16[2,16,16,128], index: 4, kind: output, shape index: {}]  }
   0x1   :  { %7913 = sst [smem:[#allocation25_spill]] %s7882_s1 }
   0x2   :  { %7914 = sst [smem:[#allocation26_spill]] %s7883_s2 }
   0x3   :  { %7915 = sst [smem:[#allocation27_spill]] %s7885_s4 }
   0x4   :  { %9 = vsyncpa [#allocation4], 0 }
   0x5   :  { %11 = vsyncpa [#allocation4 + $0x1], 0 }
   0x6   :  { %12 = vsyncpa [#allocation7], 0 }
   0x7   :  { %13 = vsyncpa [#allocation5], 0 }
   0x8   :  { %15 = vsyncpa [#allocation5 + $0x1], 0  ;;  %s6586_s15 = smov 0   ;;  %s6588_s16 = smov 0  }
   0x9   :  { %s6590_s17 = smov 0   ;;  %s6592_s18 = smov 0  }
   0xa   :  { %s6594_s19 = smov 0   ;;  %s6596_s20 = smov 0  }
   0xb   :  { %s6598_s21 = smov 0   ;;  %s6600_s22 = smov 0  }
   0xc   :  { %s6602_s23 = smov 0   ;;  %s6604_s24 = smov 0  }
   0xd   :  { %s6606_s25 = smov 0  }
   0xe LB: > { %7916 = sst [smem:[#allocation13_spill]] %s6509_s15  ;;  %s4496_s26 = sadd.s32 4294967295, %s6549_s25   ;;  %s6549_s25 = sphi %s6606_s25, %s21_s25   ;;  %s6545_s24 = sphi %s6604_s24, %s8048_s24   ;;  %s6541_s23 = sphi %s6602_s23, %s8040_s23   ;;  %s6537_s22 = sphi %s6600_s22, %s8047_s22   ;;  %s6533_s21 = sphi %s6598_s21, %s8039_s21   ;;  %s6529_s20 = sphi %s6596_s20, %s8046_s20   ;;  %s6525_s19 = sphi %s6594_s19, %s8045_s19   ;;  %s6521_s18 = sphi %s6592_s18, %s8044_s18   ;;  %s6517_s17 = sphi %s6590_s17, %s8043_s17   ;;  %s6513_s16 = sphi %s6588_s16, %s8042_s16   ;;  %s6509_s15 = sphi %s6586_s15, %s8041_s15  }
   0xf   : > { %7917 = sst [smem:[#allocation14_spill]] %s6541_s23  ;;  %s4497_s27 = sadd.s32 4294967294, %s6549_s25  }
  0x10   : > { %p53_p0 = scmp.ne.s32.totalorder %s6525_s19, %s6521_s18  ;;  %p6642_p1 = scmp.eq.s32.totalorder %s4496_s26, 0 }
  0x11   : > { %p141_p2 = scmp.ne.s32.totalorder %s6517_s17, %s6513_s16  ;;  %p142_p4 = scmp.eq.s32.totalorder %s4496_s26, 3 }
  0x12   : > { %s7918_s28 = scalar_select %p6642_p1, 1, 0 }
  0x13   : > { %p6651_p3 = por %p6642_p1, %p53_p0  ;;  %p147_p5 = scmp.ne.s32.totalorder %s6513_s16, %s6509_s15 }
  0x14   : > { %p148_p6 = scmp.eq.s32.totalorder %s4497_s27, 3  ;;  %p6657_p7 = por %p142_p4, %p141_p2 }
  0x15   : > { %s7919_s30 = scalar_select %p6651_p3, 1, 0 }
  0x16   : > { %s7920_s5 = scalar_select %p6657_p7, 1, 0 }
  0x17   : > { %p4498_p8 = scmp.ge.s32.totalorder %s6549_s25, 1  ;;  %p6662_p9 = por %p148_p6, %p147_p5 }
  0x18   : > { %p155_p10 = scmp.lt.s32.totalorder %s6549_s25, 5  ;;  %s6551_s8 = smov [#allocation6]  }
  0x19   : > { %s7921_s6 = scalar_select %p6662_p9, 1, 0 }
  0x1a   : > { %p6667_p11 = pnand %p4498_p8, %p155_p10  ;;  %s167_s9 = sshll.u32 %s6551_s8, 4  ;;  %s168_s9 = int_to_ptr.vmem [resolvable:$true] %s167_s9 }
  0x1b   : > { %7922 = sst [smem:[#allocation15_spill]] %s7921_s6  ;;  %s6552_s11 = smov [#allocation8]  }
  0x1c   : > { %s7923_s7 = scalar_select %p6667_p11, 1, 0 }
  0x1d   : > { %p6046_p12 = pneg %p6667_p11  ;;  %s180_s12 = sshll.u32 %s6552_s11, 4  ;;  %s6679_s12 = int_to_ptr.vmem [resolvable:$true] %s180_s12 }
  0x1e   : > { %s7925_s1 = sld [smem:[#allocation25_spill]] }
  0x1f   : > { %p6675_p13 = pnand %p6046_p12, %p6642_p1 }
  0x21   : > { %p6339_p2 = pneg %p6675_p13 }
  0x24   : > { %s6337_s18 = scalar_lea.hbm %s7925_s1, 9216 }
  0x25   : > { %p6338_p0 = scmp.ne.s32.totalorder %s7925_s1, %s6337_s18  ;;  %p6344_p6 = scmp.lt.u32.totalorder %s6337_s18, %s7925_s1 }
  0x27   : > { %p6340_p4 = pnand %p6339_p2, %p6338_p0 }
  0x29   : > { %p6341_p5 = pneg %p6340_p4 }
  0x2b   : > { %p6346_p8 = pnand %p6344_p6, %p6341_p5 }
  0x2d   : > { %6349 = shalt.err (!%p6346_p8)
}
  0x2e   : > { %s6350_s11 = scalar_lea.vmem %s168_s9, 9216  ;;  %p6358_p7 = scmp.lt.s32.totalorder %s168_s9, %s168_s9 }
  0x2f   : > { %p6351_p10 = scmp.ne.s32.totalorder %s168_s9, %s6350_s11  ;;  %p6359_p1 = scmp.lt.s32.totalorder %s6350_s11, %s6350_s11 }
  0x31   : > { %p6353_p12 = pnand %p6351_p10, %p6339_p2  ;;  %p6360_p3 = por %p6359_p1, %p6358_p7 }
  0x33   : > { %p6354_p9 = pneg %p6353_p12 }
  0x35   : > { %p6361_p11 = pnand %p6360_p3, %p6354_p9 }
  0x37   : > { %6364 = shalt.err (!%p6361_p11)
}
  0x38   : > { %s7894_s13 = smov 64   ;;  %s7895_s14 = smov 4  }
  0x39   : > { %6049 = dma.hbm_to_vmem [thread:$0]  (!%p6675_p13), %s7925_s1, 9216, %s168_s9, [#allocation7], %s7894_s13, %s7894_s13, %s7895_s14  }
  0x3a   : > { %s7926_s2 = sld [smem:[#allocation26_spill]] }
  0x40   : > { %s6365_s8 = scalar_lea.hbm %s7926_s2, 9216 }
  0x41   : > { %p6366_p1 = scmp.ne.s32.totalorder %s7926_s2, %s6365_s8  ;;  %p6372_p9 = scmp.lt.u32.totalorder %s6365_s8, %s7926_s2 }
  0x43   : > { %p6368_p3 = pnand %p6366_p1, %p6339_p2 }
  0x45   : > { %p6369_p7 = pneg %p6368_p3 }
  0x47   : > { %p6374_p11 = pnand %p6372_p9, %p6369_p7 }
  0x49   : > { %6377 = shalt.err (!%p6374_p11)
}
  0x4a   : > { %s6378_s9 = scalar_lea.vmem %s6679_s12, 9216  ;;  %p6386_p6 = scmp.lt.s32.totalorder %s6679_s12, %s6679_s12 }
  0x4b   : > { %p6379_p0 = scmp.ne.s32.totalorder %s6679_s12, %s6378_s9  ;;  %p6387_p8 = scmp.lt.s32.totalorder %s6378_s9, %s6378_s9 }
  0x4d   : > { %p6381_p4 = pnand %p6379_p0, %p6339_p2  ;;  %p6388_p10 = por %p6387_p8, %p6386_p6 }
  0x4f   : > { %p6382_p5 = pneg %p6381_p4 }
  0x51   : > { %p6389_p12 = pnand %p6388_p10, %p6382_p5 }
  0x53   : > { %6392 = shalt.err (!%p6389_p12)
}
  0x54   : > { %6052 = dma.hbm_to_vmem [thread:$0]  (!%p6675_p13), %s7926_s2, 9216, %s6679_s12, [#allocation7], %s7894_s13, %s7894_s13, %s7895_s14  }
  0x55   : > { %s30_s6 = sadd.s32 1, %s6541_s23  ;;  %s33_s10 = sadd.s32 1, %s6545_s24 }
  0x56   : > { %p31_p2 = scmp.ge.s32.totalorder %s30_s6, 2  ;;  %s40_s29 = sadd.s32 1, %s6529_s20 }
  0x57   : > { %p47_p1 = scmp.ne.s32.totalorder %s6529_s20, %s6525_s19  ;;  %p48_p3 = scmp.eq.s32.totalorder %s6549_s25, 0 }
  0x58   : > { %s8050_s6 = smov (%p31_p2, %s30_s6), 0  ;;  %s8052_s10 = smov (!%p31_p2, %s33_s10), %s6545_s24 }
  0x59   : > { %7927 = sst [smem:[#allocation16_spill]] %s8050_s6  ;;  %p6743_p7 = por %p48_p3, %p47_p1 }
  0x5a   : > { %s127_s26 = ssub.s32 %s6541_s23, %s8050_s6  ;;  %p35_p13 = scmp.ge.s32.totalorder %s8052_s10, 2 }
  0x5b   : > { %p6063_p9 = scmp.lt.s32.totalorder %s6549_s25, 4  ;;  %s197_s12 = sand.u32 1, %s6529_s20  }
  0x5c   : > { %s6032_s27 = smul.u32 2560, %s6545_s24  ;;  %s8054_s10 = smov (%p35_p13, %s8052_s10), 0 }
  0x5d   : > { %s6031_s8 = smul.u32 160, %s197_s12  ;;  %s37_s11 = ssub.s32 %s6545_s24, %s8054_s10 }
  0x5e   : > { %s6759_s15 = scalar_lea.hbm %s7881_s0, %s6032_s27  ;;  %p38_p11 = scmp.eq.s32.totalorder %s37_s11, 0 }
  0x5f   : > { %s128_s13 = sor.u32 %s127_s26, %s37_s11  ;;  %s7929_s1 = sadd.s32 1, %s6517_s17 }
  0x60   : > { %p129_p0 = scmp.eq.s32.totalorder %s128_s13, 0  ;;  %s201_s6 = scalar_lea.vmem [#allocation3], %s6031_s8 }
  0x61   : > { %s6762_s14 = scalar_select %p38_p11, %s6529_s20, %s40_s29  }
  0x62   : > { %s6767_s2 = scalar_select %p129_p0, %s6517_s17, %s7929_s1  }
  0x63   : > { %s208_s23 = sshll.u32 %s201_s6, 4  ;;  %p6773_p4 = pnand %p6063_p9, %p6743_p7  ;;  %s6777_s23 = int_to_ptr.vmem [resolvable:$true] %s208_s23 }
  0x64   : > { %s6779_s26 = scalar_lea.sflag [#allocation4], %s197_s12  ;;  %s6393_s13 = scalar_lea.hbm %s6759_s15, 2560 }
  0x65   : > { %p6394_p5 = scmp.ne.s32.totalorder %s6759_s15, %s6393_s13  ;;  %p6395_p6 = pneg %p6773_p4 }
  0x66   : > { %s6398_s29 = scalar_lea.hbm %s7881_s0, 5120  ;;  %p6399_p12 = scmp.lt.u32.totalorder %s6759_s15, %s7881_s0 }
  0x67   : > { %p6396_p8 = pnand %p6395_p6, %p6394_p5  ;;  %p6400_p2 = scmp.lt.u32.totalorder %s6398_s29, %s6393_s13 }
  0x68   : > { %p6402_p3 = scmp.lt.u32.totalorder %s6393_s13, %s6759_s15 }
  0x69   : > { %p6397_p10 = pneg %p6396_p8  ;;  %p6401_p1 = por %p6400_p2, %p6399_p12 }
  0x6b   : > { %p6403_p7 = por %p6402_p3, %p6401_p1 }
  0x6d   : > { %p6404_p13 = pnand %p6403_p7, %p6397_p10 }
  0x6f   : > { %6407 = shalt.err (!%p6404_p13)
}
  0x70   : > { %s6408_s12 = scalar_lea.vmem %s6777_s23, 2560  ;;  %s6555_s8 = smov [#allocation3]  }
  0x71   : > { %p6409_p9 = scmp.ne.s32.totalorder %s6777_s23, %s6408_s12  ;;  %s6413_s11 = sshll.u32 %s6555_s8, 4  ;;  %s6414_s11 = int_to_ptr.vmem [resolvable:$false] %s6413_s11 }
  0x72   : > { %s6415_s4 = scalar_lea.vmem %s6414_s11, 5120  ;;  %p6416_p5 = scmp.lt.s32.totalorder %s6777_s23, %s6414_s11 }
  0x73   : > { %p6411_p11 = pnand %p6409_p9, %p6395_p6  ;;  %p6417_p8 = scmp.lt.s32.totalorder %s6415_s4, %s6408_s12 }
  0x75   : > { %p6412_p0 = pneg %p6411_p11  ;;  %p6418_p12 = por %p6417_p8, %p6416_p5 }
  0x77   : > { %p6419_p2 = pnand %p6418_p12, %p6412_p0 }
  0x79   : > { %6422 = shalt.err (!%p6419_p2)
}
  0x7a   : > { %s7931_s13 = smov 4   ;;  %s7932_s1 = smov 64  }
  0x7b   : > { %6056 = dma.hbm_to_vmem [thread:$0]  (!%p6773_p4), %s6759_s15, 2560, %s6777_s23, %s6779_s26, %s7932_s1, %s7932_s1, %s7931_s13  }
  0x7c   : > { %p7933_p6 = scmp.ne.s32.totalorder %s7923_s7, 0 }
  0x7e   : > { %220 = sbr.rel (%p7933_p6) target bundleno = 1125 (0x465), region = 36 }
  0x85   : > { %s222_s6 = sand.u32 1, %s6525_s19   ;;  %p7934_p10 = scmp.ne.s32.totalorder %s7919_s30, 0 }
  0x86   : > { %s6813_s29 = smul.u32 160, %s222_s6  ;;  %s223_s18 = scalar_lea.sflag [#allocation4], %s222_s6 }
  0x88   : > { %s226_s27 = scalar_lea.vmem [#allocation3], %s6813_s29 }
  0x89   : > { %6496 = dma.done.wait (%p7934_p10), %s223_s18, 2560  }
  0x8a   : > { %6498 = vsyncadd (%p7934_p10), %s223_s18, 4294964736  ;;  %p7935_p1 = scmp.ne.s32.totalorder %s7918_s28, 0 }
  0x8c   : > { %6500 = dma.done.wait (%p7935_p1), [#allocation7], 18432  }
  0x8d   : > { %6502 = vsyncadd (%p7935_p1), [#allocation7], 4294948864  ;;  %s256_s23 = sand.u32 1, %s6513_s16   ;;  %v6163_v0 = vld [vmem:[#allocation6 + $0x100] sm:$0xff]   ;;  %v6165_v2 = vld [vmem:[#allocation6 + $0x108] sm:$0xff]   ;;  %s4774_s28 = sshll.u32 %s6533_s21, 6 }
  0x8e   : > { %s6827_s7 = sshll.u32 %s256_s23, 6  ;;  %v6164_v1 = vld [vmem:[#allocation6 + $0xc0] sm:$0xff]   ;;  %5187 = vmatprep.subr.bf16.mxu0 %v6163_v0  ;;  %v6166_v3 = vld [vmem:[#allocation6 + $0xc8] sm:$0xff]   ;;  %v6167_v4 = vld [vmem:[#allocation6 + $0x110] sm:$0xff]   ;;  %s6832_s30 = scalar_lea.vmem %s226_s27, %s4774_s28 [#allocation3] }
  0x8f   : > { %5295 = vmatprep.subr.bf16.mxu1 %v6164_v1  ;;  %5188 = vmatpush3.bf16.msra.mxu0 %v6163_v0  ;;  %v6168_v5 = vld [vmem:[#allocation6 + $0xd0] sm:$0xff]   ;;  %v6169_v6 = vld [vmem:[#allocation6 + $0x118] sm:$0xff]   ;;  %v6171_v8 = vld [vmem:[#allocation6 + $0x120] sm:$0xff]   ;;  %s7360_s8 = scalar_lea.vmem [#allocation9], %s6827_s7  ;;  %p4658_p4 = scmp.ne.s32.totalorder %s6533_s21, 0 }
  0x90   : > { %5296 = vmatpush3.bf16.msra.mxu1 %v6164_v1  ;;  %5189 = vmatprep.subr.bf16.mxu0 %v6165_v2  ;;  %v6170_v7 = vld [vmem:[#allocation6 + $0xd8] sm:$0xff]   ;;  %v6172_v9 = vld [vmem:[#allocation6 + $0xe0] sm:$0xff]   ;;  %v6173_v10 = vld [vmem:[#allocation6 + $0x128] sm:$0xff]  }
  0x91   : > { %5297 = vmatprep.subr.bf16.mxu1 %v6166_v3  ;;  %v6835_v11 = vld [vmem:[%s6832_s30 + $0x8] sm:$0xff]   ;;  %v6174_v12 = vld [vmem:[#allocation6 + $0xe8] sm:$0xff]   ;;  %v6175_v13 = vld [vmem:[#allocation6 + $0x130] sm:$0xff]  }
  0x92   : > { %5203 = vmatprep.mubr.bf16.mxu0 %v6835_v11  ;;  %5311 = vmatprep.mubr.bf16.mxu1 %v6835_v11  ;;  %v6176_v14 = vld [vmem:[#allocation6 + $0xf0] sm:$0xff]   ;;  %v6177_v15 = vld [vmem:[#allocation6 + $0x138] sm:$0xff]   ;;  %v6181_v17 = vld [vmem:[#allocation6 + $0x40] sm:$0xff]  }
  0x93   : > { %5190 = vmatpush3.bf16.msra.mxu0 %v6165_v2  ;;  %v6178_v16 = vld [vmem:[#allocation6 + $0xf8] sm:$0xff]   ;;  %v6185_v18 = vld [vmem:[#allocation6] sm:$0xff]   ;;  %v6182_v20 = vld [vmem:[#allocation6 + $0x48] sm:$0xff]  }
  0x94   : > { %5298 = vmatpush3.bf16.msra.mxu1 %v6166_v3  ;;  %5191 = vmatprep.subr.bf16.mxu0 %v6167_v4  ;;  %v6840_v19 = vld [vmem:[%s6832_s30 + $0x10] sm:$0xff]   ;;  %v6843_v21 = vld [vmem:[%s6832_s30 + $0x18] sm:$0xff]   ;;  %v6186_v23 = vld [vmem:[#allocation6 + $0x50] sm:$0xff]  }
  0x95   : > { %5299 = vmatprep.subr.bf16.mxu1 %v6168_v5  ;;  %v6187_v22 = vld [vmem:[#allocation6 + $0x8] sm:$0xff]   ;;  %v6850_v24 = vld [vmem:[%s6832_s30 + $0x20] sm:$0xff]   ;;  %v6853_v26 = vld [vmem:[%s6832_s30 + $0x28] sm:$0xff]  }
  0x96   : > { %v6191_v25 = vld [vmem:[#allocation6 + $0x10] sm:$0xff]   ;;  %v6189_v27 = vld [vmem:[#allocation6 + $0x58] sm:$0xff]   ;;  %v6192_v29 = vld [vmem:[#allocation6 + $0x60] sm:$0xff]  }
  0x97   : > { %5192 = vmatpush3.bf16.msra.mxu0 %v6167_v4  ;;  %v6193_v28 = vld [vmem:[#allocation6 + $0x18] sm:$0xff]   ;;  %v6860_v30 = vld [vmem:[%s6832_s30 + $0x30] sm:$0xff]   ;;  %v6863_v32 = vld [vmem:[%s6832_s30 + $0x38] sm:$0xff]  }
  0x98   : > { %5300 = vmatpush3.bf16.msra.mxu1 %v6168_v5  ;;  %5193 = vmatprep.subr.bf16.mxu0 %v6169_v6  ;;  %v6196_v31 = vld [vmem:[#allocation6 + $0x20] sm:$0xff]   ;;  %v6197_v33 = vld [vmem:[#allocation6 + $0x68] sm:$0xff]   ;;  %v6199_v35 = vld [vmem:[#allocation6 + $0x70] sm:$0xff]  }
  0x99   : > { %5301 = vmatprep.subr.bf16.mxu1 %v6170_v7  ;;  %v6198_v34 = vld [vmem:[#allocation6 + $0x28] sm:$0xff]   ;;  %v6870_v36 = vld [vmem:[%s6832_s30 + $0x40] sm:$0xff]   ;;  %v6873_v38 = vld [vmem:[%s6832_s30 + $0x48] sm:$0xff]  }
  0x9a   : > { %v6202_v37 = vld [vmem:[#allocation6 + $0x30] sm:$0xff]   ;;  %v6203_v39 = vld [vmem:[#allocation6 + $0x78] sm:$0xff]   ;;  %v6880_v41 = vld [vmem:[%s6832_s30 + $0x50] sm:$0xff]  }
  0x9b   : > { %5194 = vmatpush3.bf16.msra.mxu0 %v6169_v6  ;;  %v6204_v40 = vld [vmem:[#allocation6 + $0x38] sm:$0xff]   ;;  %v6207_v42 = vld [vmem:[#allocation6 + $0x1c0] sm:$0xff]   ;;  %v6883_v44 = vld [vmem:[%s6832_s30] sm:$0xff]  }
  0x9c   : > { %5302 = vmatpush3.bf16.msra.mxu1 %v6170_v7  ;;  %5195 = vmatprep.subr.bf16.mxu0 %v6171_v8  ;;  %v6211_v43 = vld [vmem:[#allocation6 + $0x180] sm:$0xff]   ;;  %v6890_v45 = vld [vmem:[%s6832_s30 + $0x8] sm:$0xff]   ;;  %v6208_v46 = vld [vmem:[#allocation6 + $0x1c8] sm:$0xff]  }
  0x9d   : > { %5303 = vmatprep.subr.bf16.mxu1 %v6172_v9  ;;  %v6893_v47 = vld [vmem:[%s6832_s30 + $0x10] sm:$0xff]   ;;  %v6213_v48 = vld [vmem:[#allocation6 + $0x188] sm:$0xff]   ;;  %v6212_v49 = vld [vmem:[#allocation6 + $0x1d0] sm:$0xff]  }
  0x9e   : > { %v6900_v50 = vld [vmem:[%s6832_s30 + $0x18] sm:$0xff]   ;;  %v6217_v51 = vld [vmem:[#allocation6 + $0x190] sm:$0xff]   ;;  %v6215_v53 = vld [vmem:[#allocation6 + $0x1d8] sm:$0xff]  }
  0x9f   : > { %5196 = vmatpush3.bf16.msra.mxu0 %v6171_v8  ;;  %v6903_v52 = vld [vmem:[%s6832_s30 + $0x20] sm:$0xff]   ;;  %v6219_v54 = vld [vmem:[#allocation6 + $0x198] sm:$0xff]   ;;  %v6218_v55 = vld [vmem:[#allocation6 + $0x1e0] sm:$0xff]  }
  0xa0   : > { %5304 = vmatpush3.bf16.msra.mxu1 %v6172_v9  ;;  %5197 = vmatprep.subr.bf16.mxu0 %v6173_v10  ;;  %v6910_v56 = vld [vmem:[%s6832_s30 + $0x28] sm:$0xff]   ;;  %v6222_v57 = vld [vmem:[#allocation6 + $0x1a0] sm:$0xff]   ;;  %v6223_v59 = vld [vmem:[#allocation6 + $0x1e8] sm:$0xff]  }
  0xa1   : > { %5305 = vmatprep.subr.bf16.mxu1 %v6174_v12  ;;  %v6913_v58 = vld [vmem:[%s6832_s30 + $0x30] sm:$0xff]   ;;  %v6224_v60 = vld [vmem:[#allocation6 + $0x1a8] sm:$0xff]   ;;  %v6225_v61 = vld [vmem:[#allocation6 + $0x1f0] sm:$0xff]  }
  0xa2   : > { %v6920_v62 = vld [vmem:[%s6832_s30 + $0x38] sm:$0xff]   ;;  %v6228_v63 = vld [vmem:[#allocation6 + $0x1b0] sm:$0xff]   ;;  %v6229_v1 = vld [vmem:[#allocation6 + $0x1f8] sm:$0xff]  }
  0xa3   : > { %5198 = vmatpush3.bf16.msra.mxu0 %v6173_v10  ;;  %v6923_v0 = vld [vmem:[%s6832_s30 + $0x40] sm:$0xff]   ;;  %v6230_v2 = vld [vmem:[#allocation6 + $0x1b8] sm:$0xff]   ;;  %v6233_v3 = vld [vmem:[#allocation6 + $0x140] sm:$0xff]  }
  0xa4   : > { %5306 = vmatpush3.bf16.msra.mxu1 %v6174_v12  ;;  %5199 = vmatprep.subr.bf16.mxu0 %v6175_v13  ;;  %v6930_v4 = vld [vmem:[%s6832_s30 + $0x48] sm:$0xff]   ;;  %v6933_v5 = vld [vmem:[%s6832_s30 + $0x10] sm:$0xff]   ;;  %v6940_v6 = vld [vmem:[%s6832_s30 + $0x18] sm:$0xff]  }
  0xa5   : > { %5307 = vmatprep.subr.bf16.mxu1 %v6176_v14  ;;  %v6234_v7 = vld [vmem:[#allocation6 + $0x148] sm:$0xff]   ;;  %v6943_v8 = vld [vmem:[%s6832_s30 + $0x20] sm:$0xff]   ;;  %v6950_v10 = vld [vmem:[%s6832_s30 + $0x28] sm:$0xff]  }
  0xa6   : > { %v6237_v9 = vld [vmem:[#allocation6 + $0x150] sm:$0xff]   ;;  %v6953_v12 = vld [vmem:[%s6832_s30 + $0x30] sm:$0xff]  }
  0xa7   : > { %5200 = vmatpush3.bf16.msra.mxu0 %v6175_v13  ;;  %v6239_v13 = vld [vmem:[#allocation6 + $0x158] sm:$0xff]  }
  0xa8   : > { %5308 = vmatpush3.bf16.msra.mxu1 %v6176_v14  ;;  %5201 = vmatprep.subr.bf16.mxu0 %v6177_v15  ;;  %v6241_v14 = vld [vmem:[#allocation6 + $0x160] sm:$0xff]  }
  0xa9   : > { %5309 = vmatprep.subr.bf16.mxu1 %v6178_v16 }
  0xab   : > { %5202 = vmatpush3.bf16.msra.mxu0 %v6177_v15  ;;  %v6960_v15 = vld [vmem:[%s6832_s30 + $0x38] sm:$0xff]  }
  0xac   : > { %5310 = vmatpush3.bf16.msra.mxu1 %v6178_v16  ;;  %5223 = vmatprep.subr.bf16.mxu0 %v6181_v17  ;;  %v6963_v16 = vld [vmem:[%s6832_s30 + $0x40] sm:$0xff]  }
  0xad   : > { %5331 = vmatprep.subr.bf16.mxu1 %v6185_v18 }
  0xae   : > { %5204 = vmatmul.mubr.bf16.vlgmr.msra.gmra.mrb[0].mxu0 %v6840_v19 }
  0xaf   : > { %5312 = vmatmul.mubr.bf16.vlgmr.msra.gmra.mrb[0].mxu1 %v6840_v19  ;;  %5224 = vmatpush3.bf16.msra.mxu0 %v6181_v17  ;;  %v6244_v17 = vld [vmem:[#allocation6 + $0x168] sm:$0xff]  }
  0xb0   : > { %5225 = vmatprep.subr.bf16.mxu0 %v6182_v20  ;;  %5207 = vmatprep.mubr.bf16.mxu0 %v6843_v21 }
  0xb1   : > { %5315 = vmatprep.mubr.bf16.mxu1 %v6843_v21  ;;  %5332 = vmatpush3.bf16.msra.mxu1 %v6185_v18  ;;  %v6245_v18 = vld [vmem:[#allocation6 + $0x170] sm:$0xff]  }
  0xb2   : > { %5333 = vmatprep.subr.bf16.mxu1 %v6187_v22 }
  0xb3   : > { %5226 = vmatpush3.bf16.msra.mxu0 %v6182_v20  ;;  %v6970_v20 = vld [vmem:[%s6832_s30 + $0x48] sm:$0xff]  }
  0xb4   : > { %5227 = vmatprep.subr.bf16.mxu0 %v6186_v23 }
  0xb5   : > { %5334 = vmatpush3.bf16.msra.mxu1 %v6187_v22  ;;  %v6973_v22 = vld [vmem:[%s6832_s30 + $0x50] sm:$0xff]  }
  0xb6   : > { %5208 = vmatmul.mubr.bf16.gmra.mrb[4].mxu0 %v6850_v24  ;;  %5335 = vmatprep.subr.bf16.mxu1 %v6191_v25 }
  0xb7   : > { %5316 = vmatmul.mubr.bf16.gmra.mrb[4].mxu1 %v6850_v24  ;;  %5228 = vmatpush3.bf16.msra.mxu0 %v6186_v23  ;;  %v6248_v23 = vld [vmem:[#allocation6 + $0x178] sm:$0xff]  }
  0xb8   : > { %5211 = vmatprep.mubr.bf16.mxu0 %v6853_v26  ;;  %5229 = vmatprep.subr.bf16.mxu0 %v6189_v27 }
  0xb9   : > { %5319 = vmatprep.mubr.bf16.mxu1 %v6853_v26  ;;  %5336 = vmatpush3.bf16.msra.mxu1 %v6191_v25  ;;  %v6249_v25 = vld [vmem:[#allocation6 + $0x80] sm:$0xff]  }
  0xba   : > { %5337 = vmatprep.subr.bf16.mxu1 %v6193_v28 }
  0xbb   : > { %5230 = vmatpush3.bf16.msra.mxu0 %v6189_v27  ;;  %v6980_v27 = vld [vmem:[%s6832_s30 + $0x58] sm:$0xff]  }
  0xbc   : > { %5231 = vmatprep.subr.bf16.mxu0 %v6192_v29 }
  0xbd   : > { %5338 = vmatpush3.bf16.msra.mxu1 %v6193_v28  ;;  %v6250_v28 = vld [vmem:[#allocation6 + $0x88] sm:$0xff]  }
  0xbe   : > { %5212 = vmatmul.mubr.bf16.gmra.mrb[8].mxu0 %v6860_v30  ;;  %5339 = vmatprep.subr.bf16.mxu1 %v6196_v31 }
  0xbf   : > { %5320 = vmatmul.mubr.bf16.gmra.mrb[8].mxu1 %v6860_v30  ;;  %5232 = vmatpush3.bf16.msra.mxu0 %v6192_v29  ;;  %v6251_v29 = vld [vmem:[#allocation6 + $0x90] sm:$0xff]  }
  0xc0   : > { %5215 = vmatprep.mubr.bf16.mxu0 %v6863_v32  ;;  %5323 = vmatprep.mubr.bf16.mxu1 %v6863_v32 }
  0xc1   : > { %5233 = vmatprep.subr.bf16.mxu0 %v6197_v33  ;;  %5340 = vmatpush3.bf16.msra.mxu1 %v6196_v31  ;;  %v6252_v31 = vld [vmem:[#allocation6 + $0x98] sm:$0xff]  }
  0xc2   : > { %5341 = vmatprep.subr.bf16.mxu1 %v6198_v34 }
  0xc3   : > { %5234 = vmatpush3.bf16.msra.mxu0 %v6197_v33  ;;  %v6253_v33 = vld [vmem:[#allocation6 + $0xa0] sm:$0xff]  }
  0xc4   : > { %5235 = vmatprep.subr.bf16.mxu0 %v6199_v35 }
  0xc5   : > { %5342 = vmatpush3.bf16.msra.mxu1 %v6198_v34  ;;  %v6261_v34 = vld [vmem:[#allocation6 + $0x220] sm:$0xff]  }
  0xc6   : > { %5216 = vmatmul.mubr.bf16.gmra.mrb[12].mxu0 %v6870_v36  ;;  %5343 = vmatprep.subr.bf16.mxu1 %v6202_v37 }
  0xc7   : > { %5324 = vmatmul.mubr.bf16.gmra.mrb[12].mxu1 %v6870_v36  ;;  %5219 = vmatprep.mubr.bf16.mxu0 %v6873_v38 }
  0xc8   : > { %5236 = vmatpush3.bf16.msra.mxu0 %v6199_v35  ;;  %5327 = vmatprep.mubr.bf16.mxu1 %v6873_v38  ;;  %v6262_v35 = vld [vmem:[#allocation6 + $0x228] sm:$0xff]  }
  0xc9   : > { %5344 = vmatpush3.bf16.msra.mxu1 %v6202_v37  ;;  %5237 = vmatprep.subr.bf16.mxu0 %v6203_v39  ;;  %v6264_v37 = vld [vmem:[#allocation6 + $0x238] sm:$0xff]  }
  0xca   : > { %5345 = vmatprep.subr.bf16.mxu1 %v6204_v40 }
  0xcc   : > { %5238 = vmatpush3.bf16.msra.mxu0 %v6203_v39 }
  0xcd   : > { %5346 = vmatpush3.bf16.msra.mxu1 %v6204_v40  ;;  %5259 = vmatprep.subr.bf16.mxu0 %v6207_v42 }
  0xce   : > { %5220 = vmatmul.mubr.bf16.gmra.mrb[16].mxu0 %v6880_v41  ;;  %5367 = vmatprep.subr.bf16.mxu1 %v6211_v43 }
  0xcf   : > { %5328 = vmatmul.mubr.bf16.gmra.mrb[16].mxu1 %v6880_v41  ;;  %5239 = vmatprep.mubr.bf16.mxu0 %v6883_v44 }
  0xd0   : > { %5347 = vmatprep.mubr.bf16.mxu1 %v6883_v44 }
  0xd6   : > { %5240 = vmatmul.mubr.bf16.vlgmr.msra.gmra.mrb[0].mxu0 %v6890_v45 }
  0xd7   : > { %5348 = vmatmul.mubr.bf16.vlgmr.msra.gmra.mrb[0].mxu1 %v6890_v45  ;;  %5260 = vmatpush3.bf16.msra.mxu0 %v6207_v42 }
  0xd8   : > { %5261 = vmatprep.subr.bf16.mxu0 %v6208_v46  ;;  %5243 = vmatprep.mubr.bf16.mxu0 %v6893_v47 }
  0xd9   : > { %5351 = vmatprep.mubr.bf16.mxu1 %v6893_v47  ;;  %5368 = vmatpush3.bf16.msra.mxu1 %v6211_v43 }
  0xda   : > { %5369 = vmatprep.subr.bf16.mxu1 %v6213_v48 }
  0xdb   : > { %5262 = vmatpush3.bf16.msra.mxu0 %v6208_v46 }
  0xdc   : > { %5263 = vmatprep.subr.bf16.mxu0 %v6212_v49 }
  0xdd   : > { %5370 = vmatpush3.bf16.msra.mxu1 %v6213_v48 }
  0xde   : > { %5244 = vmatmul.mubr.bf16.gmra.mrb[4].mxu0 %v6900_v50  ;;  %5371 = vmatprep.subr.bf16.mxu1 %v6217_v51 }
  0xdf   : > { %5352 = vmatmul.mubr.bf16.gmra.mrb[4].mxu1 %v6900_v50  ;;  %5264 = vmatpush3.bf16.msra.mxu0 %v6212_v49 }
  0xe0   : > { %5247 = vmatprep.mubr.bf16.mxu0 %v6903_v52  ;;  %5265 = vmatprep.subr.bf16.mxu0 %v6215_v53 }
  0xe1   : > { %5355 = vmatprep.mubr.bf16.mxu1 %v6903_v52  ;;  %5372 = vmatpush3.bf16.msra.mxu1 %v6217_v51 }
  0xe2   : > { %5373 = vmatprep.subr.bf16.mxu1 %v6219_v54 }
  0xe3   : > { %5266 = vmatpush3.bf16.msra.mxu0 %v6215_v53 }
  0xe4   : > { %5267 = vmatprep.subr.bf16.mxu0 %v6218_v55 }
  0xe5   : > { %5374 = vmatpush3.bf16.msra.mxu1 %v6219_v54 }
  0xe6   : > { %5248 = vmatmul.mubr.bf16.gmra.mrb[8].mxu0 %v6910_v56  ;;  %5375 = vmatprep.subr.bf16.mxu1 %v6222_v57 }
  0xe7   : > { %5356 = vmatmul.mubr.bf16.gmra.mrb[8].mxu1 %v6910_v56  ;;  %5268 = vmatpush3.bf16.msra.mxu0 %v6218_v55 }
  0xe8   : > { %5251 = vmatprep.mubr.bf16.mxu0 %v6913_v58  ;;  %5359 = vmatprep.mubr.bf16.mxu1 %v6913_v58 }
  0xe9   : > { %5269 = vmatprep.subr.bf16.mxu0 %v6223_v59  ;;  %5376 = vmatpush3.bf16.msra.mxu1 %v6222_v57 }
  0xea   : > { %5377 = vmatprep.subr.bf16.mxu1 %v6224_v60 }
  0xeb   : > { %5270 = vmatpush3.bf16.msra.mxu0 %v6223_v59 }
  0xec   : > { %5271 = vmatprep.subr.bf16.mxu0 %v6225_v61 }
  0xed   : > { %5378 = vmatpush3.bf16.msra.mxu1 %v6224_v60 }
  0xee   : > { %5252 = vmatmul.mubr.bf16.gmra.mrb[12].mxu0 %v6920_v62  ;;  %5379 = vmatprep.subr.bf16.mxu1 %v6228_v63 }
  0xef   : > { %5360 = vmatmul.mubr.bf16.gmra.mrb[12].mxu1 %v6920_v62  ;;  %5255 = vmatprep.mubr.bf16.mxu0 %v6923_v0 }
  0xf0   : > { %5272 = vmatpush3.bf16.msra.mxu0 %v6225_v61  ;;  %5363 = vmatprep.mubr.bf16.mxu1 %v6923_v0 }
  0xf1   : > { %5380 = vmatpush3.bf16.msra.mxu1 %v6228_v63  ;;  %5273 = vmatprep.subr.bf16.mxu0 %v6229_v1 }
  0xf2   : > { %5381 = vmatprep.subr.bf16.mxu1 %v6230_v2 }
  0xf4   : > { %5274 = vmatpush3.bf16.msra.mxu0 %v6229_v1 }
  0xf5   : > { %5382 = vmatpush3.bf16.msra.mxu1 %v6230_v2  ;;  %5403 = vmatprep.subr.bf16.mxu0 %v6233_v3 }
  0xf6   : > { %5256 = vmatmul.mubr.bf16.gmra.mrb[16].mxu0 %v6930_v4 }
  0xf7   : > { %5364 = vmatmul.mubr.bf16.gmra.mrb[16].mxu1 %v6930_v4  ;;  %5275 = vmatprep.mubr.bf16.mxu0 %v6933_v5 }
  0xf8   : > { %5383 = vmatprep.mubr.bf16.mxu1 %v6933_v5 }
  0xfe   : > { %5276 = vmatmul.mubr.bf16.vlgmr.msra.gmra.mrb[0].mxu0 %v6940_v6 }
  0xff   : > { %5384 = vmatmul.mubr.bf16.vlgmr.msra.gmra.mrb[0].mxu1 %v6940_v6  ;;  %5404 = vmatpush3.bf16.msra.mxu0 %v6233_v3 }
 0x100   : > { %5405 = vmatprep.subr.bf16.mxu0 %v6234_v7  ;;  %5279 = vmatprep.mubr.bf16.mxu0 %v6943_v8 }
 0x101   : > { %5387 = vmatprep.mubr.bf16.mxu1 %v6943_v8 }
 0x103   : > { %5406 = vmatpush3.bf16.msra.mxu0 %v6234_v7 }
 0x104   : > { %5407 = vmatprep.subr.bf16.mxu0 %v6237_v9 }
 0x106   : > { %5280 = vmatmul.mubr.bf16.gmra.mrb[4].mxu0 %v6950_v10 }
 0x107   : > { %5388 = vmatmul.mubr.bf16.gmra.mrb[4].mxu1 %v6950_v10  ;;  %5408 = vmatpush3.bf16.msra.mxu0 %v6237_v9 }
 0x108   : > { %5283 = vmatprep.mubr.bf16.mxu0 %v6953_v12  ;;  %5391 = vmatprep.mubr.bf16.mxu1 %v6953_v12 }
 0x109   : > { %5409 = vmatprep.subr.bf16.mxu0 %v6239_v13 }
 0x10b   : > { %5410 = vmatpush3.bf16.msra.mxu0 %v6239_v13 }
 0x10c   : > { %5411 = vmatprep.subr.bf16.mxu0 %v6241_v14 }
 0x10e   : > { %5284 = vmatmul.mubr.bf16.gmra.mrb[8].mxu0 %v6960_v15 }
 0x10f   : > { %5392 = vmatmul.mubr.bf16.gmra.mrb[8].mxu1 %v6960_v15  ;;  %5412 = vmatpush3.bf16.msra.mxu0 %v6241_v14 }
 0x110   : > { %5287 = vmatprep.mubr.bf16.mxu0 %v6963_v16  ;;  %5395 = vmatprep.mubr.bf16.mxu1 %v6963_v16 }
 0x111   : > { %5413 = vmatprep.subr.bf16.mxu0 %v6244_v17 }
 0x113   : > { %5414 = vmatpush3.bf16.msra.mxu0 %v6244_v17 }
 0x114   : > { %5415 = vmatprep.subr.bf16.mxu0 %v6245_v18 }
 0x116   : > { %5288 = vmatmul.mubr.bf16.gmra.mrb[12].mxu0 %v6970_v20 }
 0x117   : > { %5396 = vmatmul.mubr.bf16.gmra.mrb[12].mxu1 %v6970_v20  ;;  %5291 = vmatprep.mubr.bf16.mxu0 %v6973_v22 }
 0x118   : > { %5399 = vmatprep.mubr.bf16.mxu1 %v6973_v22  ;;  %5416 = vmatpush3.bf16.msra.mxu0 %v6245_v18 }
 0x119   : > { %5417 = vmatprep.subr.bf16.mxu0 %v6248_v23 }
 0x11c   : > { %5418 = vmatpush3.bf16.msra.mxu0 %v6248_v23 }
 0x11d   : > { %5439 = vmatprep.subr.bf16.mxu0 %v6249_v25 }
 0x11e   : > { %5292 = vmatmul.mubr.bf16.gmra.mrb[16].mxu0 %v6980_v27 }
 0x11f   : > { %5400 = vmatmul.mubr.bf16.gmra.mrb[16].mxu1 %v6980_v27  ;;  %5419 = vmatprep.mubr.bf16.mxu0 %v6835_v11  ;;  %v6254_v11 = vld [vmem:[#allocation6 + $0xa8] sm:$0xff]  }
 0x126   : > { %5420 = vmatmul.mubr.bf16.vlgmr.msra.gmra.mrb[20].mxu0 %v6840_v19  ;;  %v6255_v19 = vld [vmem:[#allocation6 + $0xb0] sm:$0xff]  }
 0x127   : > { %5440 = vmatpush3.bf16.msra.mxu0 %v6249_v25  ;;  %5423 = vmatprep.mubr.bf16.mxu0 %v6843_v21  ;;  %v6256_v21 = vld [vmem:[#allocation6 + $0xb8] sm:$0xff]  }
 0x128   : > { %5441 = vmatprep.subr.bf16.mxu0 %v6250_v28 }
 0x12b   : > { %5442 = vmatpush3.bf16.msra.mxu0 %v6250_v28 }
 0x12c   : > { %5443 = vmatprep.subr.bf16.mxu0 %v6251_v29 }
 0x12e   : > { %5424 = vmatmul.mubr.bf16.gmra.mrb[24].mxu0 %v6850_v24  ;;  %v6257_v24 = vld [vmem:[#allocation6 + $0x200] sm:$0xff]  }
 0x12f   : > { %5444 = vmatpush3.bf16.msra.mxu0 %v6251_v29  ;;  %5427 = vmatprep.mubr.bf16.mxu0 %v6853_v26  ;;  %v6258_v26 = vld [vmem:[#allocation6 + $0x208] sm:$0xff]  }
 0x130   : > { %5445 = vmatprep.subr.bf16.mxu0 %v6252_v31 }
 0x133   : > { %5446 = vmatpush3.bf16.msra.mxu0 %v6252_v31 }
 0x134   : > { %5447 = vmatprep.subr.bf16.mxu0 %v6253_v33 }
 0x136   : > { %5428 = vmatmul.mubr.bf16.gmra.mrb[28].mxu0 %v6860_v30  ;;  %v6259_v30 = vld [vmem:[#allocation6 + $0x210] sm:$0xff]  }
 0x137   : > { %5448 = vmatpush3.bf16.msra.mxu0 %v6253_v33  ;;  %5431 = vmatprep.mubr.bf16.mxu0 %v6863_v32  ;;  %v6260_v32 = vld [vmem:[#allocation6 + $0x218] sm:$0xff]  }
 0x138   : > { %5449 = vmatprep.subr.bf16.mxu0 %v6254_v11 }
 0x13b   : > { %5450 = vmatpush3.bf16.msra.mxu0 %v6254_v11 }
 0x13c   : > { %5451 = vmatprep.subr.bf16.mxu0 %v6255_v19 }
 0x13e   : > { %5432 = vmatmul.mubr.bf16.gmra.mrb[32].mxu0 %v6870_v36  ;;  %v6263_v36 = vld [vmem:[#allocation6 + $0x230] sm:$0xff]  }
 0x13f   : > { %5435 = vmatprep.mubr.bf16.mxu0 %v6873_v38  ;;  %5452 = vmatpush3.bf16.msra.mxu0 %v6255_v19  ;;  %v2174_v38 = vlaneseq }
 0x140   : > { %5453 = vmatprep.subr.bf16.mxu0 %v6256_v21 }
 0x141   : > { %v7014_v39 = vshrl.u32 %v2174_v38, 7 }
 0x143   : > { %5454 = vmatpush3.bf16.msra.mxu0 %v6256_v21  ;;  %v2177_v40 = vadd.s32 16, %v7014_v39  ;;  %vm7898_vm0 = vcmp.lt.s32.totalorder %v7014_v39, 1  ;;  %v2179_v51 = vadd.s32 32, %v7014_v39  ;;  %vm7901_vm11 = vcmp.lt.s32.totalorder %v7014_v39, 7 }
 0x144   : > { %5475 = vmatprep.subr.bf16.mxu0 %v6257_v24 }
 0x145   : > { %v2199_v61 = vand.u32 15, %v2179_v51 }
 0x146   : > { %5436 = vmatmul.mubr.bf16.gmra.mrb[36].mxu0 %v6880_v41 }
 0x147   : > { %5455 = vmatprep.mubr.bf16.mxu0 %v6883_v44  ;;  %v2197_v44 = vand.u32 15, %v2177_v40  ;;  %vm7046_vm2 = vcmp.eq.s32.totalorder %v2199_v61, 0 }
 0x149   : > { %vm7024_vm1 = vcmp.eq.s32.totalorder %v2197_v44, 0 }
 0x14e   : > { %5456 = vmatmul.mubr.bf16.vlgmr.msra.gmra.mrb[20].mxu0 %v6890_v45 }
 0x14f   : > { %5476 = vmatpush3.bf16.msra.mxu0 %v6257_v24  ;;  %5459 = vmatprep.mubr.bf16.mxu0 %v6893_v47 }
 0x150   : > { %5477 = vmatprep.subr.bf16.mxu0 %v6258_v26 }
 0x153   : > { %5478 = vmatpush3.bf16.msra.mxu0 %v6258_v26 }
 0x154   : > { %5479 = vmatprep.subr.bf16.mxu0 %v6259_v30 }
 0x156   : > { %5460 = vmatmul.mubr.bf16.gmra.mrb[24].mxu0 %v6900_v50 }
 0x157   : > { %5480 = vmatpush3.bf16.msra.mxu0 %v6259_v30  ;;  %5463 = vmatprep.mubr.bf16.mxu0 %v6903_v52 }
 0x158   : > { %5481 = vmatprep.subr.bf16.mxu0 %v6260_v32 }
 0x15b   : > { %5482 = vmatpush3.bf16.msra.mxu0 %v6260_v32 }
 0x15c   : > { %5483 = vmatprep.subr.bf16.mxu0 %v6261_v34 }
 0x15e   : > { %5464 = vmatmul.mubr.bf16.gmra.mrb[28].mxu0 %v6910_v56  ;;  %v2181_v56 = vadd.s32 48, %v7014_v39 }
 0x15f   : > { %5484 = vmatpush3.bf16.msra.mxu0 %v6261_v34  ;;  %5467 = vmatprep.mubr.bf16.mxu0 %v6913_v58 }
 0x160   : > { %5485 = vmatprep.subr.bf16.mxu0 %v6262_v35 }
 0x163   : > { %5486 = vmatpush3.bf16.msra.mxu0 %v6262_v35 }
 0x164   : > { %5487 = vmatprep.subr.bf16.mxu0 %v6263_v36 }
 0x166   : > { %5468 = vmatmul.mubr.bf16.gmra.mrb[32].mxu0 %v6920_v62 }
 0x167   : > { %5471 = vmatprep.mubr.bf16.mxu0 %v6923_v0  ;;  %5488 = vmatpush3.bf16.msra.mxu0 %v6263_v36  ;;  %v2187_v36 = vadd.s32 96, %v7014_v39 }
 0x168   : > { %5489 = vmatprep.subr.bf16.mxu0 %v6264_v37 }
 0x16b   : > { %5490 = vmatpush3.bf16.msra.mxu0 %v6264_v37 }
 0x16e   : > { %5472 = vmatmul.mubr.bf16.gmra.mrb[36].mxu0 %v6930_v4  ;;  %v2201_v4 = vand.u32 15, %v2181_v56 }
 0x16f   : > { %5491 = vmatprep.mubr.bf16.mxu0 %v6933_v5 }
 0x170   : > { %vm7052_vm3 = vcmp.eq.s32.totalorder %v2201_v4, 0 }
 0x176   : > { %5492 = vmatmul.mubr.bf16.vlgmr.msra.gmra.mrb[20].mxu0 %v6940_v6 }
 0x177   : > { %5495 = vmatprep.mubr.bf16.mxu0 %v6943_v8  ;;  %v2183_v8 = vadd.s32 64, %v7014_v39 }
 0x179   : > { %v2203_v25 = vand.u32 15, %v2183_v8  ;;  %v2191_v8 = vadd.s32 128, %v7014_v39 }
 0x17b   : > { %vm7076_vm4 = vcmp.eq.s32.totalorder %v2203_v25, 0 }
 0x17e   : > { %5496 = vmatmul.mubr.bf16.gmra.mrb[24].mxu0 %v6950_v10 }
 0x17f   : > { %5499 = vmatprep.mubr.bf16.mxu0 %v6953_v12 }
 0x186   : > { %5500 = vmatmul.mubr.bf16.gmra.mrb[28].mxu0 %v6960_v15 }
 0x187   : > { %5503 = vmatprep.mubr.bf16.mxu0 %v6963_v16 }
 0x18e   : > { %5504 = vmatmul.mubr.bf16.gmra.mrb[32].mxu0 %v6970_v20  ;;  %v2185_v20 = vadd.s32 80, %v7014_v39 }
 0x18f   : > { %5507 = vmatprep.mubr.bf16.mxu0 %v6973_v22 }
 0x190   : > { %v2205_v30 = vand.u32 15, %v2185_v20 }
 0x192   : > { %vm7082_vm5 = vcmp.eq.s32.totalorder %v2205_v30, 0 }
 0x196   : > { %5508 = vmatmul.mubr.bf16.gmra.mrb[36].mxu0 %v6980_v27 }
 0x1d1   : > { %v5277_v41 = vpop.f32.mrb[0].mxu0 }
 0x1d2   : > { %v5385_v42 = vpop.f32.mrb[0].mxu1  ;;  %v7017_v43 = vpop.f32.mrb[1].mxu0 }
 0x1d3   : > { %v2217_v45 = vrot.slane %v5385_v42, 7  ;;  %v7019_v46 = vpop.f32.mrb[1].mxu1  ;;  %v5278_v47 = vpop.f32.mrb[2].mxu0 }
 0x1d4   : > { %v2215_v48 = vrot.slane %v7019_v46, 7  ;;  %v5386_v49 = vpop.f32.mrb[2].mxu1  ;;  %v971_v50 = vpop.f32.mrb[3].mxu0 }
 0x1d5   : > { %v2218_v52 = vrot.slane %v5386_v49, 7  ;;  %v1524_v53 = vpop.f32.mrb[3].mxu1 }
 0x1d6   : > { %v2216_v54 = vrot.slane %v1524_v53, 7  ;;  %v2207_v53 = vand.u32 15, %v2187_v36 }
 0x1d7   : > { %v2252_v57 = vsel %vm7898_vm0, %v2217_v45, %v2218_v52 }
 0x1d8   : > { %v7031_v58 = vadd.f32 %v5278_v47, %v2252_v57  ;;  %v2253_v59 = vsel %vm7898_vm0, %v2216_v54, %v2217_v45  ;;  %v2254_v60 = vsel %vm7898_vm0, %v2215_v48, %v2216_v54  ;;  %vm7106_vm6 = vcmp.eq.s32.totalorder %v2207_v53, 0 }
 0x1d9   : > { %v2278_v62 = vsel %vm7024_vm1, 0.0, %v2253_v59  ;;  %v7041_v63 = vadd.f32 %v2254_v60, %v971_v50  ;;  %v5281_v0 = vpop.f32.mrb[4].mxu0  ;;  %v2189_v50 = vadd.s32 112, %v7014_v39  ;;  %v7950_v53 = vmov 0 }
 0x1da   : > { %v7043_v1 = vadd.f32 %v5277_v41, %v2278_v62  ;;  %v5389_v2 = vpop.f32.mrb[4].mxu1  ;;  %v984_v3 = vpop.f32.mrb[5].mxu0 }
 0x1db   : > { %v2221_v5 = vrot.slane %v5389_v2, 7  ;;  %v1537_v6 = vpop.f32.mrb[5].mxu1  ;;  %v5282_v7 = vpop.f32.mrb[6].mxu0  ;;  %v2209_v4 = vand.u32 15, %v2189_v50 }
 0x1dc   : > { %v2219_v9 = vrot.slane %v1537_v6, 7  ;;  %v5390_v12 = vpop.f32.mrb[6].mxu1  ;;  %v987_v13 = vpop.f32.mrb[7].mxu0 }
 0x1dd   : > { %v2222_v14 = vrot.slane %v5390_v12, 7  ;;  %v1540_v15 = vpop.f32.mrb[7].mxu1  ;;  %v7946_v12 = vmov 0  ;;  %vm7112_vm7 = vcmp.eq.s32.totalorder %v2209_v4, 0 }
 0x1de   : > { %v2251_v16 = vsel %vm7898_vm0, %v2218_v52, %v2219_v9  ;;  %v2220_v17 = vrot.slane %v1540_v15, 7  ;;  %v7947_v12 = vsel %vm7106_vm6, 4294967295, %v7946_v12 }
 0x1df   : > { %v2280_v22 = vsel %vm7046_vm2, 0.0, %v2251_v16  ;;  %v2248_v23 = vsel %vm7898_vm0, %v2221_v5, %v2222_v14 }
 0x1e0   : > { %v7061_v27 = vadd.f32 %v2280_v22, %v984_v3  ;;  %v7063_v28 = vadd.f32 %v5282_v7, %v2248_v23  ;;  %v2249_v29 = vsel %vm7898_vm0, %v2220_v17, %v2221_v5  ;;  %v2250_v31 = vsel %vm7898_vm0, %v2219_v9, %v2220_v17 }
 0x1e1   : > { %v2282_v33 = vsel %vm7052_vm3, 0.0, %v2249_v29  ;;  %v7071_v11 = vadd.f32 %v2250_v31, %v987_v13  ;;  %v5285_v19 = vpop.f32.mrb[8].mxu0  ;;  %v7948_v22 = vmov 0  ;;  %v2193_v23 = vadd.s32 144, %v7014_v39 }
 0x1e2   : > { %v7073_v21 = vadd.f32 %v5281_v0, %v2282_v33  ;;  %v5393_v24 = vpop.f32.mrb[8].mxu1  ;;  %v1000_v26 = vpop.f32.mrb[9].mxu0  ;;  %v7949_v22 = vsel %vm7112_vm7, 4294967295, %v7948_v22  ;;  %v2211_v31 = vand.u32 15, %v2191_v8 }
 0x1e3   : > { %v2225_v32 = vrot.slane %v5393_v24, 7  ;;  %v1553_v34 = vpop.f32.mrb[9].mxu1  ;;  %v5286_v35 = vpop.f32.mrb[10].mxu0 }
 0x1e4   : > { %v2223_v37 = vrot.slane %v1553_v34, 7  ;;  %v5394_v40 = vpop.f32.mrb[10].mxu1  ;;  %v1003_v41 = vpop.f32.mrb[11].mxu0  ;;  %vm2272_vm8 = vcmp.eq.s32.totalorder %v2211_v31, 0 }
 0x1e5   : > { %v2226_v42 = vrot.slane %v5394_v40, 7  ;;  %v1556_v44 = vpop.f32.mrb[11].mxu1 }
 0x1e6   : > { %v2247_v45 = vsel %vm7898_vm0, %v2222_v14, %v2223_v37  ;;  %v2224_v47 = vrot.slane %v1556_v44, 7 }
 0x1e7   : > { %v2284_v51 = vsel %vm7076_vm4, 0.0, %v2247_v45  ;;  %v2244_v52 = vsel %vm7898_vm0, %v2225_v32, %v2226_v42 }
 0x1e8   : > { %v7091_v54 = vadd.f32 %v2284_v51, %v1000_v26  ;;  %v7093_v56 = vadd.f32 %v5286_v35, %v2244_v52  ;;  %v2245_v57 = vsel %vm7898_vm0, %v2224_v47, %v2225_v32  ;;  %v2246_v59 = vsel %vm7898_vm0, %v2223_v37, %v2224_v47 }
 0x1e9   : > { %v2286_v60 = vsel %vm7082_vm5, 0.0, %v2245_v57  ;;  %v7101_v61 = vadd.f32 %v2246_v59, %v1003_v41  ;;  %v5289_v62 = vpop.f32.mrb[12].mxu0  ;;  %v2195_v35 = vand.u32 15, %v7014_v39  ;;  %v2213_v41 = vand.u32 15, %v2193_v23 }
 0x1ea   : > { %v7103_v0 = vadd.f32 %v5285_v19, %v2286_v60  ;;  %v5397_v2 = vpop.f32.mrb[12].mxu1  ;;  %v1016_v3 = vpop.f32.mrb[13].mxu0  ;;  %v2180_v23 = vadd.s32 40, %v7014_v39 }
 0x1eb   : > { %v2229_v5 = vrot.slane %v5397_v2, 7  ;;  %v1569_v6 = vpop.f32.mrb[13].mxu1  ;;  %v5290_v7 = vpop.f32.mrb[14].mxu0  ;;  %vm7136_vm9 = vcmp.eq.s32.totalorder %v2195_v35, 0  ;;  %vm2274_vm10 = vcmp.eq.s32.totalorder %v2213_v41, 0 }
 0x1ec   : > { %v2227_v9 = vrot.slane %v1569_v6, 7  ;;  %v5398_v13 = vpop.f32.mrb[14].mxu1  ;;  %v1019_v14 = vpop.f32.mrb[15].mxu0  ;;  %v7951_v53 = vsel %vm7136_vm9, 4294967295, %v7950_v53 }
 0x1ed   : > { %v2230_v15 = vrot.slane %v5398_v13, 7  ;;  %v1572_v16 = vpop.f32.mrb[15].mxu1 }
 0x1ee   : > { %v2243_v17 = vsel %vm7898_vm0, %v2226_v42, %v2227_v9  ;;  %v2228_v20 = vrot.slane %v1572_v16, 7 }
 0x1ef   : > { %v2288_v25 = vsel %vm7106_vm6, 0.0, %v2243_v17  ;;  %v2240_v29 = vsel %vm7898_vm0, %v2229_v5, %v2230_v15 }
 0x1f0   : > { %v7121_v33 = vadd.f32 %v2288_v25, %v1016_v3  ;;  %v7123_v19 = vadd.f32 %v5290_v7, %v2240_v29  ;;  %v2241_v24 = vsel %vm7898_vm0, %v2228_v20, %v2229_v5  ;;  %v2242_v26 = vsel %vm7898_vm0, %v2227_v9, %v2228_v20 }
 0x1f1   : > { %v2290_v30 = vsel %vm7112_vm7, 0.0, %v2241_v24  ;;  %v7131_v32 = vadd.f32 %v2242_v26, %v1019_v14  ;;  %v5293_v34 = vpop.f32.mrb[16].mxu0  ;;  %v2178_v20 = vadd.s32 24, %v7014_v39 }
 0x1f2   : > { %v7134_v36 = vadd.f32 %v5289_v62, %v2290_v30  ;;  %v5401_v37 = vpop.f32.mrb[16].mxu1  ;;  %v1032_v40 = vpop.f32.mrb[17].mxu0 }
 0x1f3   : > { %v2233_v42 = vrot.slane %v5401_v37, 7  ;;  %v1585_v44 = vpop.f32.mrb[17].mxu1  ;;  %v5294_v45 = vpop.f32.mrb[18].mxu0  ;;  %v2198_v35 = vand.u32 15, %v2178_v20  ;;  %v2200_v37 = vand.u32 15, %v2180_v23 }
 0x1f4   : > { %v2231_v47 = vrot.slane %v1585_v44, 7  ;;  %v5402_v50 = vpop.f32.mrb[18].mxu1  ;;  %v1035_v51 = vpop.f32.mrb[19].mxu0 }
 0x1f5   : > { %v2234_v52 = vrot.slane %v5402_v50, 7  ;;  %v1588_v57 = vpop.f32.mrb[19].mxu1  ;;  %vm7200_vm13 = vcmp.eq.s32.totalorder %v2198_v35, 15  ;;  %vm7204_vm14 = vcmp.eq.s32.totalorder %v2200_v37, 15  ;;  %v2188_v37 = vadd.s32 104, %v7014_v39 }
 0x1f6   : > { %v2239_v59 = vsel %vm7898_vm0, %v2230_v15, %v2231_v47  ;;  %v2232_v60 = vrot.slane %v1588_v57, 7 }
 0x1f7   : > { %v2292_v62 = vsel %vm2272_vm8, 0.0, %v2239_v59  ;;  %v2236_v2 = vsel %vm7898_vm0, %v2233_v42, %v2234_v52  ;;  %v2255_v3 = vsel %vm7898_vm0, %v2234_v52, %v2215_v48  ;;  %v2176_v48 = vadd.s32 8, %v7014_v39 }
 0x1f8   : > { %v7148_v4 = vadd.f32 %v2292_v62, %v1032_v40  ;;  %v2276_v5 = vsel %vm7136_vm9, 0.0, %v2255_v3  ;;  %v7152_v6 = vadd.f32 %v5294_v45, %v2236_v2  ;;  %v2237_v7 = vsel %vm7898_vm0, %v2232_v60, %v2233_v42  ;;  %v7181_v42 = vld [vmem:[%s7884_s3] ss:$0 sm:$0xff] }
 0x1f9   : > { %v2377_v8 = vadd.f32 %v2276_v5, %v7017_v43  ;;  %v2238_v9 = vsel %vm7898_vm0, %v2231_v47, %v2232_v60  ;;  %v2294_v13 = vsel %vm2274_vm10, 0.0, %v2237_v7  ;;  %v2196_v16 = vand.u32 15, %v2176_v48 }
 0x1fa   : > { %v7159_v46 = vadd.f32 %v2238_v9, %v1035_v51  ;;  %v7161_v14 = vadd.f32 %v5293_v34, %v2294_v13  ;;  %v2182_v40 = vadd.s32 56, %v7014_v39  ;;  %v2184_v47 = vadd.s32 72, %v7014_v39 }
 0x1fb   : > { %vm7170_vm12 = vcmp.eq.s32.totalorder %v2196_v16, 15  ;;  %v2186_v59 = vadd.s32 88, %v7014_v39 }
 0x1fc   : > { %v2202_v9 = vand.u32 15, %v2182_v40 }
 0x1fe   : > { %vm7228_vm15 = vcmp.eq.s32.totalorder %v2202_v9, 15 }
 0x249   : > { %v5493_v15 = vpop.f32.mrb[20].mxu0 }
 0x24a   : > { %v7164_v17 = vpop.f32.mrb[21].mxu0  ;;  %v2298_v43 = vrot.slane %v5493_v15, 1 }
 0x24b   : > { %v5494_v25 = vpop.f32.mrb[22].mxu0  ;;  %v2296_v24 = vrot.slane %v7164_v17, 1 }
 0x24c   : > { %v2299_v29 = vrot.slane %v5494_v25, 1  ;;  %v2078_v31 = vpop.f32.mrb[23].mxu0 }
 0x24d   : > { %v2297_v26 = vrot.slane %v2078_v31, 1  ;;  %v2206_v31 = vand.u32 15, %v2186_v59 }
 0x24e   : > { %v2333_v34 = vsel %vm7901_vm11, %v2298_v43, %v2299_v29 }
 0x24f   : > { %v2399_v41 = vadd.f32 %v7043_v1, %v2333_v34  ;;  %v2334_v44 = vsel %vm7901_vm11, %v2297_v26, %v2298_v43  ;;  %v2335_v45 = vsel %vm7901_vm11, %v2296_v24, %v2297_v26  ;;  %v7195_v1 = vld [vmem:[%s7884_s3 + $0x1] ss:$0 sm:$0xff]  ;;  %vm7247_vm10 = vcmp.eq.s32.totalorder %v2206_v31, 15 }
 0x250   : > { %v2358_v50 = vsel %vm7170_vm12, 0.0, %v2334_v44  ;;  %v2397_v51 = vadd.f32 %v2377_v8, %v2335_v45 }
 0x251   : > { %v2398_v52 = vadd.f32 %v7041_v63, %v2358_v50  ;;  %v5497_v57 = vpop.f32.mrb[24].mxu0  ;;  %v2204_v63 = vand.u32 15, %v2184_v47  ;;  %v2424_v13 = vmul.f32 %v7181_v42, %v2399_v41 }
 0x252   : > { %v2422_v60 = vmul.f32 %v7181_v42, %v2397_v51  ;;  %v2091_v62 = vpop.f32.mrb[25].mxu0  ;;  %v2302_v15 = vrot.slane %v5497_v57, 1 }
 0x253   : > { %v2423_v5 = vmul.f32 %v7181_v42, %v2398_v52  ;;  %v2300_v7 = vrot.slane %v2091_v62, 1  ;;  %v5498_v8 = vpop.f32.mrb[26].mxu0  ;;  %vm7234_vm8 = vcmp.eq.s32.totalorder %v2204_v63, 15 }
 0x254   : > { %v2447_v48 = vadd.f32 %v7195_v1, %v2422_v60  ;;  %v2303_v16 = vrot.slane %v5498_v8, 1  ;;  %v2094_v20 = vpop.f32.mrb[27].mxu0  ;;  %v7243_v8 = vadd.s32 152, %v7014_v39 }
 0x255   : > { %v2448_v23 = vadd.f32 %v7195_v1, %v2423_v5  ;;  %v2332_v25 = vsel %vm7901_vm11, %v2299_v29, %v2300_v7  ;;  %v2301_v43 = vrot.slane %v2094_v20, 1  ;;  %v2449_v29 = vadd.f32 %v7195_v1, %v2424_v13 }
 0x256   : > { %v2467_v26 = vmax.f32 %v2447_v48, 0.0  ;;  %v2360_v34 = vsel %vm7200_vm13, 0.0, %v2332_v25  ;;  %v2329_v35 = vsel %vm7901_vm11, %v2302_v15, %v2303_v16  ;;  %v2208_v5 = vand.u32 15, %v2188_v37 }
 0x257   : > { %v2468_v40 = vmax.f32 %v2448_v23, 0.0  ;;  %v2400_v41 = vadd.f32 %v7031_v58, %v2360_v34  ;;  %v2403_v44 = vadd.f32 %v7073_v21, %v2329_v35  ;;  %v2330_v45 = vsel %vm7901_vm11, %v2301_v43, %v2302_v15 }
 0x258   : > { %v2331_v47 = vsel %vm7901_vm11, %v2300_v7, %v2301_v43  ;;  %v2362_v50 = vsel %vm7204_vm14, 0.0, %v2330_v45  ;;  %v7240_v7 = vadd.s32 120, %v7014_v39  ;;  %v7962_v48 = vmov 0 }
 0x259   : > { %v2487_v52 = vpack.c.bf16 %v2468_v40, %v2467_v26  ;;  %v2425_v58 = vmul.f32 %v7181_v42, %v2400_v41  ;;  %v2401_v21 = vadd.f32 %v7061_v27, %v2331_v47  ;;  %v5501_v57 = vpop.f32.mrb[28].mxu0  ;;  %v2402_v60 = vadd.f32 %v7071_v11, %v2362_v50 }
 0x25a   : > { %v2107_v62 = vpop.f32.mrb[29].mxu0  ;;  %v7963_v48 = vsel %vm7247_vm10, 4294967295, %v7962_v48  ;;  %v7252_v11 = vadd.s32 136, %v7014_v39  ;;  %v2469_v15 = vmax.f32 %v2449_v29, 0.0  ;;  %v2306_v23 = vrot.slane %v5501_v57, 1 }
 0x25b   : > { %2497 = vst [vmem:[#allocation2] sm:$0xff] %v2487_v52  ;;  %v2450_v9 = vadd.f32 %v7195_v1, %v2425_v58  ;;  %v2426_v27 = vmul.f32 %v7181_v42, %v2401_v21  ;;  %v2304_v13 = vrot.slane %v2107_v62, 1  ;;  %v5502_v63 = vpop.f32.mrb[30].mxu0  ;;  %7964 = vst [vmem:[#allocation17_spill] sm:$0xff] %v7963_v48  ;;  %v2427_v20 = vmul.f32 %v7181_v42, %v2402_v60 }
 0x25c   : > { %v2307_v25 = vrot.slane %v5502_v63, 1  ;;  %v2110_v43 = vpop.f32.mrb[31].mxu0  ;;  %v2428_v34 = vmul.f32 %v7181_v42, %v2403_v44  ;;  %vm7270_vm0 = vcmp.eq.s32.totalorder %v2208_v5, 15  ;;  %v7965_v21 = vmov 0 }
 0x25d   : > { %v2470_v26 = vmax.f32 %v2450_v9, 0.0  ;;  %v2451_v35 = vadd.f32 %v7195_v1, %v2426_v27  ;;  %v2328_v31 = vsel %vm7901_vm11, %v2303_v16, %v2304_v13  ;;  %v2452_v37 = vadd.f32 %v7195_v1, %v2427_v20 }
 0x25e   : > { %v2364_v40 = vsel %vm7228_vm15, 0.0, %v2328_v31  ;;  %v2325_v41 = vsel %vm7901_vm11, %v2306_v23, %v2307_v25  ;;  %v2305_v45 = vrot.slane %v2110_v43, 1  ;;  %v7966_v21 = vsel %vm7270_vm0, 4294967295, %v7965_v21 }
 0x25f   : > { %v2488_v29 = vpack.c.bf16 %v2470_v26, %v2469_v15  ;;  %v2471_v47 = vmax.f32 %v2451_v35, 0.0  ;;  %v2404_v50 = vadd.f32 %v7063_v28, %v2364_v40  ;;  %v2407_v44 = vadd.f32 %v7103_v0, %v2325_v41  ;;  %7967 = vst [vmem:[#allocation18_spill] sm:$0xff] %v7966_v21 }
 0x260   : > { %v2472_v52 = vmax.f32 %v2452_v37, 0.0  ;;  %v2326_v58 = vsel %vm7901_vm11, %v2305_v45, %v2306_v23  ;;  %v2327_v16 = vsel %vm7901_vm11, %v2304_v13, %v2305_v45  ;;  %v2453_v57 = vadd.f32 %v7195_v1, %v2428_v34 }
 0x261   : > { %2498 = vst [vmem:[#allocation2 + $0x8] sm:$0xff] %v2488_v29  ;;  %v2429_v60 = vmul.f32 %v7181_v42, %v2404_v50  ;;  %v2366_v28 = vsel %vm7234_vm8, 0.0, %v2326_v58  ;;  %v2405_v0 = vadd.f32 %v7091_v54, %v2327_v16  ;;  %v5505_v62 = vpop.f32.mrb[32].mxu0  ;;  %v2210_v5 = vand.u32 15, %v7240_v7 }
 0x262   : > { %v2489_v9 = vpack.c.bf16 %v2472_v52, %v2471_v47  ;;  %v2406_v27 = vadd.f32 %v7101_v61, %v2366_v28  ;;  %v2123_v63 = vpop.f32.mrb[33].mxu0  ;;  %v2214_v13 = vand.u32 15, %v7243_v8  ;;  %v2212_v26 = vand.u32 15, %v7252_v11 }
 0x263   : > { %v2454_v15 = vadd.f32 %v7195_v1, %v2429_v60  ;;  %v2430_v20 = vmul.f32 %v7181_v42, %v2405_v0  ;;  %v2308_v23 = vrot.slane %v2123_v63, 1  ;;  %v5506_v43 = vpop.f32.mrb[34].mxu0  ;;  %v2432_v54 = vmul.f32 %v7181_v42, %v2407_v44 }
 0x264   : > { %2499 = vst [vmem:[#allocation2 + $0x10] sm:$0xff] %v2489_v9  ;;  %v2431_v34 = vmul.f32 %v7181_v42, %v2406_v27  ;;  %v2310_v35 = vrot.slane %v5505_v62, 1  ;;  %v2311_v61 = vrot.slane %v5506_v43, 1  ;;  %v2126_v31 = vpop.f32.mrb[35].mxu0  ;;  %v2473_v37 = vmax.f32 %v2453_v57, 0.0 }
 0x265   : > { %v2474_v7 = vmax.f32 %v2454_v15, 0.0  ;;  %v2455_v8 = vadd.f32 %v7195_v1, %v2430_v20  ;;  %v2324_v40 = vsel %vm7901_vm11, %v2307_v25, %v2308_v23  ;;  %v2309_v29 = vrot.slane %v2126_v31, 1 }
 0x266   : > { %v2456_v41 = vadd.f32 %v7195_v1, %v2431_v34  ;;  %v2368_v11 = vsel %vm7247_vm10, 0.0, %v2324_v40  ;;  %v2321_v45 = vsel %vm7901_vm11, %v2310_v35, %v2311_v61  ;;  %v2457_v58 = vadd.f32 %v7195_v1, %v2432_v54 }
 0x267   : > { %v2490_v47 = vpack.c.bf16 %v2474_v7, %v2473_v37  ;;  %v2475_v50 = vmax.f32 %v2455_v8, 0.0  ;;  %v2408_v44 = vadd.f32 %v7093_v56, %v2368_v11  ;;  %v2411_v52 = vadd.f32 %v7134_v36, %v2321_v45 }
 0x268   : > { %v2476_v16 = vmax.f32 %v2456_v41, 0.0  ;;  %v2322_v25 = vsel %vm7901_vm11, %v2309_v29, %v2310_v35  ;;  %v2323_v57 = vsel %vm7901_vm11, %v2308_v23, %v2309_v29  ;;  %vm7307_vm10 = vcmp.eq.s32.totalorder %v2210_v5, 15 }
 0x269   : > { %2500 = vst [vmem:[#allocation2 + $0x18] sm:$0xff] %v2490_v47  ;;  %v2433_v60 = vmul.f32 %v7181_v42, %v2408_v44  ;;  %v2370_v28 = vsel %vm7270_vm0, 0.0, %v2322_v25  ;;  %v2409_v0 = vadd.f32 %v7121_v33, %v2323_v57  ;;  %v5509_v56 = vpop.f32.mrb[36].mxu0  ;;  %v7968_v27 = vmov 0 }
 0x26a   : > { %v2491_v62 = vpack.c.bf16 %v2476_v16, %v2475_v50  ;;  %v2410_v36 = vadd.f32 %v7131_v32, %v2370_v28  ;;  %v2139_v9 = vpop.f32.mrb[37].mxu0  ;;  %v7969_v27 = vsel %vm7307_vm10, 4294967295, %v7968_v27  ;;  %vm7311_vm7 = vcmp.eq.s32.totalorder %v2214_v13, 15 }
 0x26b   : > { %7970 = vst [vmem:[#allocation19_spill] sm:$0xff] %v7969_v27  ;;  %v2458_v15 = vadd.f32 %v7195_v1, %v2433_v60  ;;  %v2434_v20 = vmul.f32 %v7181_v42, %v2409_v0  ;;  %v2312_v23 = vrot.slane %v2139_v9, 1  ;;  %v5510_v43 = vpop.f32.mrb[38].mxu0  ;;  %vm7317_vm11 = vcmp.eq.s32.totalorder %v2212_v26, 15 }
 0x26c   : > { %v2477_v32 = vmax.f32 %v2457_v58, 0.0  ;;  %2501 = vst [vmem:[#allocation2 + $0x20] sm:$0xff] %v2491_v62  ;;  %v2435_v5 = vmul.f32 %v7181_v42, %v2410_v36  ;;  %v2314_v54 = vrot.slane %v5509_v56, 1  ;;  %v2315_v34 = vrot.slane %v5510_v43, 1  ;;  %v2142_v13 = vpop.f32.mrb[39].mxu0 }
 0x26d   : > { %v2478_v35 = vmax.f32 %v2458_v15, 0.0  ;;  %v2436_v31 = vmul.f32 %v7181_v42, %v2411_v52  ;;  %v2459_v37 = vadd.f32 %v7195_v1, %v2434_v20  ;;  %vm7975_vm0 = vcmp.lt.s32.totalorder %v7014_v39, 7 }
 0x26e   : > { %v2320_v7 = vsel %vm7975_vm0, %v2311_v61, %v2312_v23  ;;  %v2460_v26 = vadd.f32 %v7195_v1, %v2435_v5  ;;  %vm7976_vm9 = vmmov %vm7975_vm0  ;;  %v2313_v52 = vrot.slane %v2142_v13, 1 }
 0x26f   : > { %v2372_v8 = vsel %vm7307_vm10, 0.0, %v2320_v7  ;;  %v2317_v40 = vsel %vm7976_vm9, %v2314_v54, %v2315_v34  ;;  %vm7977_vm6 = vmmov %vm7975_vm0  ;;  %v2492_v11 = vpack.c.bf16 %v2478_v35, %v2477_v32  ;;  %v2479_v45 = vmax.f32 %v2459_v37, 0.0 }
 0x270   : > { %v2336_v41 = vsel %vm7977_vm6, %v2315_v34, %v2296_v24  ;;  %v2412_v29 = vadd.f32 %v7123_v19, %v2372_v8  ;;  %v2480_v47 = vmax.f32 %v2460_v26, 0.0  ;;  %v2415_v50 = vadd.f32 %v7161_v14, %v2317_v40  ;;  %vm7978_vm6 = vmmov %vm7975_vm0 }
 0x271   : > { %v2376_v61 = vsel %vm7311_vm7, 0.0, %v2336_v41  ;;  %2502 = vst [vmem:[#allocation2 + $0x28] sm:$0xff] %v2492_v11  ;;  %v2461_v58 = vadd.f32 %v7195_v1, %v2436_v31  ;;  %v2318_v19 = vsel %vm7975_vm0, %v2313_v52, %v2314_v54  ;;  %v2319_v14 = vsel %vm7978_vm6, %v2312_v23, %v2313_v52 }
 0x272   : > { %v2416_v44 = vadd.f32 %v7152_v6, %v2376_v61  ;;  %v2437_v17 = vmul.f32 %v7181_v42, %v2412_v29  ;;  %v2493_v16 = vpack.c.bf16 %v2480_v47, %v2479_v45  ;;  %v2440_v24 = vmul.f32 %v7181_v42, %v2415_v50 }
 0x273   : > { %v2374_v6 = vsel %vm7317_vm11, 0.0, %v2318_v19  ;;  %v2413_v0 = vadd.f32 %v7148_v4, %v2319_v14  ;;  %v2481_v62 = vmax.f32 %v2461_v58, 0.0  ;;  %v6556_v54 = vmov (!%p4658_p4), 0  }
 0x274   : > { %v2441_v25 = vmul.f32 %v7181_v42, %v2416_v44  ;;  %v2462_v57 = vadd.f32 %v7195_v1, %v2437_v17  ;;  %2503 = vst [vmem:[#allocation2 + $0x30] sm:$0xff] %v2493_v16  ;;  %v2465_v60 = vadd.f32 %v7195_v1, %v2440_v24  ;;  %v2414_v56 = vadd.f32 %v7159_v46, %v2374_v6 }
 0x275   : > { %v2438_v15 = vmul.f32 %v7181_v42, %v2413_v0  ;;  %2511 = vst [vmem:[#allocation2] sm:$0xff] (!%p4658_p4), %v6556_v54 }
 0x276   : > { %v2466_v28 = vadd.f32 %v7195_v1, %v2441_v25  ;;  %v2482_v36 = vmax.f32 %v2462_v57, 0.0  ;;  %v2485_v9 = vmax.f32 %v2465_v60, 0.0  ;;  %v2439_v20 = vmul.f32 %v7181_v42, %v2414_v56 }
 0x277   : > { %v2463_v33 = vadd.f32 %v7195_v1, %v2438_v15 }
 0x278   : > { %v2486_v63 = vmax.f32 %v2466_v28, 0.0  ;;  %v2494_v23 = vpack.c.bf16 %v2482_v36, %v2481_v62  ;;  %v2464_v32 = vadd.f32 %v7195_v1, %v2439_v20  ;;  %2510 = sbr.rel (%p4658_p4) target bundleno = 639 (0x27f), region = 52 }
 0x279   : > { %v2483_v4 = vmax.f32 %v2463_v33, 0.0 }
 0x27a   : > { %v2496_v43 = vpack.c.bf16 %v2486_v63, %v2485_v9  ;;  %2504 = vst [vmem:[#allocation2 + $0x38] sm:$0xff] %v2494_v23  ;;  %v2484_v5 = vmax.f32 %v2464_v32, 0.0 }
 0x27c   : > { %2506 = vst [vmem:[#allocation2 + $0x48] sm:$0xff] %v2496_v43  ;;  %v2495_v46 = vpack.c.bf16 %v2484_v5, %v2483_v4 }
 0x27e   : > { %2505 = vst [vmem:[#allocation2 + $0x40] sm:$0xff] %v2495_v46 }
 0x27f PF: > { %p4659_p3 = scmp.ne.s32.totalorder %s6533_s21, 1 }
 0x280   : > { %v6557_v42 = vmov (!%p4659_p3), 0  }
 0x281   : > { %2515 = sbr.rel (%p4659_p3) target bundleno = 648 (0x288), region = 56  ;;  %2517 = vst [vmem:[#allocation2 + $0x48] sm:$0xff] (!%p4659_p3), %v6557_v42 }
 0x288 PF: > { %v6265_v1 = vld [vmem:[#allocation8 + $0x100] sm:$0xff]   ;;  %v6266_v34 = vld [vmem:[#allocation8 + $0x108] sm:$0xff]   ;;  %v6267_v13 = vld [vmem:[#allocation8 + $0x110] sm:$0xff]   ;;  %vm7983_vm7 = vcmp.lt.s32.totalorder %v7014_v39, 7  ;;  %s4793_s6 = sshll.u32 %s6533_s21, 4  ;;  %s4769_s29 = sshll.u32 %s6537_s22, 5 }
 0x289   : > { %5511 = vmatprep.subr.bf16.mxu1 %v6265_v1  ;;  %v6268_v35 = vld [vmem:[#allocation8 + $0x118] sm:$0xff]   ;;  %v6269_v37 = vld [vmem:[#allocation8 + $0x120] sm:$0xff]   ;;  %v6278_v26 = vld [vmem:[#allocation8 + $0x148] sm:$0xff]   ;;  %s4377_s21 = sadd.s32 %s4793_s6, %s4769_s29  ;;  %s4380_s18 = sshll.u32 %s7360_s8, 4  ;;  %s7813_s18 = int_to_ptr.vmem [resolvable:$true] %s4380_s18 }
 0x28a   : > { %5512 = vmatpush3.bf16.msra.mxu1 %v6265_v1  ;;  %v7364_v31 = vld [vmem:[#allocation2 + $0x8] sm:$0xff]  ;;  %v6276_v7 = vld [vmem:[#allocation8 + $0x140] sm:$0xff]   ;;  %v6270_v8 = vld [vmem:[#allocation8 + $0x128] sm:$0xff]   ;;  %s4770_s22 = sshll.u32 %s4377_s21, 6  ;;  %s8034_s28 = sld [smem:[#allocation27_spill]] }
 0x28b   : > { %5513 = vmatprep.subr.bf16.mxu1 %v6266_v34  ;;  %5527 = vmatprep.mubr.bf16.mxu1 %v7364_v31  ;;  %v6280_v40 = vld [vmem:[#allocation8 + $0x150] sm:$0xff]   ;;  %v6282_v11 = vld [vmem:[#allocation8 + $0x158] sm:$0xff]   ;;  %v6284_v29 = vld [vmem:[#allocation8 + $0x160] sm:$0xff]   ;;  %s7820_s15 = scalar_lea.sflag [#allocation5], %s256_s23  ;;  %s6423_s9 = scalar_lea.vmem %s7813_s18, 1024 }
 0x28c   : > { %5719 = vmatprep.mubr.bf16.mxu0 %v7364_v31  ;;  %5703 = vmatprep.subr.bf16.mxu0 %v6276_v7  ;;  %v6271_v41 = vld [vmem:[#allocation8 + $0x130] sm:$0xff]   ;;  %v6272_v45 = vld [vmem:[#allocation8 + $0x138] sm:$0xff]   ;;  %v6273_v61 = vld [vmem:[#allocation8 + $0x40] sm:$0xff]   ;;  %p6424_p7 = scmp.ne.s32.totalorder %s7813_s18, %s6423_s9  ;;  %p8035_p13 = scmp.ne.s32.totalorder %s7920_s5, 0 }
 0x28d   : > { %5704 = vmatpush3.bf16.msra.mxu0 %v6276_v7  ;;  %v6286_v47 = vld [vmem:[#allocation8 + $0x168] sm:$0xff]   ;;  %v7368_v50 = vld [vmem:[#allocation2 + $0x10] sm:$0xff]  ;;  %v6288_v58 = vld [vmem:[#allocation8 + $0x170] sm:$0xff]   ;;  %s6558_s26 = smov [#allocation9]  }
 0x28e   : > { %5514 = vmatpush3.bf16.msra.mxu1 %v6266_v34  ;;  %5705 = vmatprep.subr.bf16.mxu0 %v6278_v26  ;;  %v6274_v44 = vld [vmem:[#allocation8 + $0x48] sm:$0xff]   ;;  %v6275_v17 = vld [vmem:[#allocation8 + $0x50] sm:$0xff]   ;;  %v6290_v16 = vld [vmem:[#allocation8 + $0x178] sm:$0xff]   ;;  %p6425_p9 = pnand %p6424_p7, %p8035_p13  ;;  %s6427_s12 = sshll.u32 %s6558_s26, 4  ;;  %s6428_s12 = int_to_ptr.vmem [resolvable:$false] %s6427_s12 }
 0x28f   : > { %5515 = vmatprep.subr.bf16.mxu1 %v6267_v13  ;;  %v7370_v52 = vld [vmem:[#allocation2 + $0x18] sm:$0xff]  ;;  %v7374_v24 = vld [vmem:[#allocation2 + $0x20] sm:$0xff]  ;;  %v6277_v25 = vld [vmem:[#allocation8 + $0x58] sm:$0xff]   ;;  %s6429_s11 = scalar_lea.vmem %s6428_s12, 2048  ;;  %p6430_p0 = scmp.lt.s32.totalorder %s7813_s18, %s6428_s12 }
 0x290   : > { %v7376_v19 = vld [vmem:[#allocation2 + $0x28] sm:$0xff]  ;;  %v6292_v57 = vld [vmem:[#allocation8 + $0x80] sm:$0xff]   ;;  %v6294_v6 = vld [vmem:[#allocation8 + $0x88] sm:$0xff]   ;;  %p6426_p11 = pneg %p6425_p9  ;;  %p6431_p5 = scmp.lt.s32.totalorder %s6429_s11, %s6423_s9 }
 0x291   : > { %5706 = vmatpush3.bf16.msra.mxu0 %v6278_v26  ;;  %v6279_v14 = vld [vmem:[#allocation8 + $0x60] sm:$0xff]   ;;  %v6281_v28 = vld [vmem:[#allocation8 + $0x68] sm:$0xff]   ;;  %v6296_v56 = vld [vmem:[#allocation8 + $0x90] sm:$0xff]  }
 0x292   : > { %5516 = vmatpush3.bf16.msra.mxu1 %v6267_v13  ;;  %5707 = vmatprep.subr.bf16.mxu0 %v6280_v40  ;;  %v7380_v60 = vld [vmem:[#allocation2 + $0x30] sm:$0xff]  ;;  %v7383_v0 = vld [vmem:[#allocation2 + $0x38] sm:$0xff]  ;;  %v6283_v62 = vld [vmem:[#allocation8 + $0x70] sm:$0xff]   ;;  %p6432_p8 = por %p6431_p5, %p6430_p0 }
 0x293   : > { %5517 = vmatprep.subr.bf16.mxu1 %v6268_v35  ;;  %v6298_v36 = vld [vmem:[#allocation8 + $0x98] sm:$0xff]   ;;  %v7388_v9 = vld [vmem:[#allocation2 + $0x40] sm:$0xff]  ;;  %v6300_v20 = vld [vmem:[#allocation8 + $0xa0] sm:$0xff]  }
 0x294   : > { %v6285_v63 = vld [vmem:[#allocation8 + $0x78] sm:$0xff]   ;;  %v7391_v15 = vld [vmem:[#allocation2] sm:$0xff]  ;;  %v6287_v23 = vld [vmem:[#allocation8 + $0x1c0] sm:$0xff]   ;;  %p6433_p12 = pnand %p6432_p8, %p6426_p11 }
 0x295   : > { %5708 = vmatpush3.bf16.msra.mxu0 %v6280_v40  ;;  %v6302_v43 = vld [vmem:[#allocation8 + $0xa8] sm:$0xff]   ;;  %v6304_v32 = vld [vmem:[#allocation8 + $0xb0] sm:$0xff]   ;;  %v6306_v5 = vld [vmem:[#allocation8 + $0xb8] sm:$0xff]  }
 0x296   : > { %5518 = vmatpush3.bf16.msra.mxu1 %v6268_v35  ;;  %5709 = vmatprep.subr.bf16.mxu0 %v6282_v11  ;;  %v6289_v33 = vld [vmem:[#allocation8 + $0x1c8] sm:$0xff]   ;;  %v6291_v4 = vld [vmem:[#allocation8 + $0x1d0] sm:$0xff]   ;;  %v6293_v46 = vld [vmem:[#allocation8 + $0x1d8] sm:$0xff]  }
 0x297   : > { %5519 = vmatprep.subr.bf16.mxu1 %v6269_v37  ;;  %v7402_v54 = vld [vmem:[#allocation8 + $0x200] sm:$0xff]   ;;  %v7407_v1 = vld [vmem:[#allocation8 + $0x208] sm:$0xff]   ;;  %v7413_v13 = vld [vmem:[#allocation8 + $0x210] sm:$0xff]  }
 0x298   : > { %v6295_v42 = vld [vmem:[#allocation8 + $0x1e0] sm:$0xff]   ;;  %v6297_v34 = vld [vmem:[#allocation8 + $0x1e8] sm:$0xff]   ;;  %v6299_v35 = vld [vmem:[#allocation8 + $0x1f0] sm:$0xff]  }
 0x299   : > { %5710 = vmatpush3.bf16.msra.mxu0 %v6282_v11  ;;  %v6301_v7 = vld [vmem:[#allocation8 + $0x1f8] sm:$0xff]   ;;  %v7425_v26 = vld [vmem:[#allocation8 + $0x220] sm:$0xff]   ;;  %v7431_v40 = vld [vmem:[#allocation8 + $0x228] sm:$0xff]  }
 0x29a   : > { %5520 = vmatpush3.bf16.msra.mxu1 %v6269_v37  ;;  %5711 = vmatprep.subr.bf16.mxu0 %v6284_v29  ;;  %v7419_v37 = vld [vmem:[#allocation8 + $0x218] sm:$0xff]   ;;  %v7437_v11 = vld [vmem:[#allocation8 + $0x230] sm:$0xff]   ;;  %vm7984_vm9 = vmmov %vm7983_vm7 }
 0x29b   : > { %5521 = vmatprep.subr.bf16.mxu1 %v6270_v8  ;;  %vm7985_vm11 = vmmov %vm7983_vm7  ;;  %v7636_v55 = vld [vmem:[%s7884_s3 + $0x3] ss:$0 sm:$0xff]  ;;  %v7645_v27 = vld [vmem:[%s6832_s30 + $0x38] sm:$0xff]  }
 0x29c   : > { %vm7986_vm0 = vmmov %vm7983_vm7 }
 0x29d   : > { %5712 = vmatpush3.bf16.msra.mxu0 %v6284_v29  ;;  %v7443_v29 = vld [vmem:[#allocation8 + $0x238] sm:$0xff]   ;;  %vm7987_vm6 = vmmov %vm7986_vm0 }
 0x29e   : > { %5522 = vmatpush3.bf16.msra.mxu1 %v6270_v8  ;;  %5713 = vmatprep.subr.bf16.mxu0 %v6286_v47  ;;  %v6303_v8 = vld [vmem:[#allocation8 + $0xc0] sm:$0xff]  }
 0x29f   : > { %5523 = vmatprep.subr.bf16.mxu1 %v6271_v41 }
 0x2a1   : > { %5714 = vmatpush3.bf16.msra.mxu0 %v6286_v47  ;;  %v6311_v47 = vld [vmem:[#allocation8 + $0xe0] sm:$0xff]  }
 0x2a2   : > { %5524 = vmatpush3.bf16.msra.mxu1 %v6271_v41  ;;  %5715 = vmatprep.subr.bf16.mxu0 %v6288_v58  ;;  %v6305_v41 = vld [vmem:[#allocation8 + $0xc8] sm:$0xff]  }
 0x2a3   : > { %5525 = vmatprep.subr.bf16.mxu1 %v6272_v45 }
 0x2a5   : > { %5716 = vmatpush3.bf16.msra.mxu0 %v6288_v58  ;;  %v6315_v58 = vld [vmem:[#allocation8 + $0xf0] sm:$0xff]  }
 0x2a6   : > { %5526 = vmatpush3.bf16.msra.mxu1 %v6272_v45  ;;  %5717 = vmatprep.subr.bf16.mxu0 %v6290_v16  ;;  %v6307_v45 = vld [vmem:[#allocation8 + $0xd0] sm:$0xff]  }
 0x2a7   : > { %5543 = vmatprep.subr.bf16.mxu1 %v6273_v61 }
 0x2a9   : > { %5528 = vmatmul.mubr.bf16.vlgmr.msra.gmra.mrb[20].mxu1 %v7368_v50  ;;  %5718 = vmatpush3.bf16.msra.mxu0 %v6290_v16  ;;  %v6317_v16 = vld [vmem:[#allocation8 + $0xf8] sm:$0xff]  }
 0x2aa   : > { %5544 = vmatpush3.bf16.msra.mxu1 %v6273_v61  ;;  %5531 = vmatprep.mubr.bf16.mxu1 %v7370_v52  ;;  %v6309_v61 = vld [vmem:[#allocation8 + $0xd8] sm:$0xff]  }
 0x2ab   : > { %5545 = vmatprep.subr.bf16.mxu1 %v6274_v44  ;;  %5735 = vmatprep.subr.bf16.mxu0 %v6292_v57 }
 0x2ac   : > { %5720 = vmatmul.mubr.bf16.vlgmr.msra.gmra.mrb[40].mxu0 %v7368_v50 }
 0x2ad   : > { %5736 = vmatpush3.bf16.msra.mxu0 %v6292_v57  ;;  %5723 = vmatprep.mubr.bf16.mxu0 %v7370_v52  ;;  %v6321_v57 = vld [vmem:[#allocation8 + $0x8] sm:$0xff]  }
 0x2ae   : > { %5546 = vmatpush3.bf16.msra.mxu1 %v6274_v44  ;;  %5737 = vmatprep.subr.bf16.mxu0 %v6294_v6  ;;  %v6313_v44 = vld [vmem:[#allocation8 + $0xe8] sm:$0xff]  }
 0x2af   : > { %5547 = vmatprep.subr.bf16.mxu1 %v6275_v17 }
 0x2b1   : > { %5532 = vmatmul.mubr.bf16.gmra.mrb[24].mxu1 %v7374_v24  ;;  %5738 = vmatpush3.bf16.msra.mxu0 %v6294_v6  ;;  %v6324_v6 = vld [vmem:[#allocation8 + $0x18] sm:$0xff]  }
 0x2b2   : > { %5548 = vmatpush3.bf16.msra.mxu1 %v6275_v17  ;;  %5535 = vmatprep.mubr.bf16.mxu1 %v7376_v19  ;;  %v7456_v17 = vld [vmem:[#allocation2 + $0x48] sm:$0xff] }
 0x2b3   : > { %5549 = vmatprep.subr.bf16.mxu1 %v6277_v25  ;;  %5739 = vmatprep.subr.bf16.mxu0 %v6296_v56 }
 0x2b4   : > { %5724 = vmatmul.mubr.bf16.gmra.mrb[44].mxu0 %v7374_v24 }
 0x2b5   : > { %5740 = vmatpush3.bf16.msra.mxu0 %v6296_v56  ;;  %5727 = vmatprep.mubr.bf16.mxu0 %v7376_v19  ;;  %v6326_v56 = vld [vmem:[#allocation8 + $0x28] sm:$0xff]  }
 0x2b6   : > { %5550 = vmatpush3.bf16.msra.mxu1 %v6277_v25  ;;  %5741 = vmatprep.subr.bf16.mxu0 %v6298_v36  ;;  %v6319_v25 = vld [vmem:[#allocation8] sm:$0xff]  }
 0x2b7   : > { %5551 = vmatprep.subr.bf16.mxu1 %v6279_v14 }
 0x2b9   : > { %5536 = vmatmul.mubr.bf16.gmra.mrb[28].mxu1 %v7380_v60  ;;  %5742 = vmatpush3.bf16.msra.mxu0 %v6298_v36  ;;  %v6328_v36 = vld [vmem:[#allocation8 + $0x38] sm:$0xff]  }
 0x2ba   : > { %5552 = vmatpush3.bf16.msra.mxu1 %v6279_v14  ;;  %5539 = vmatprep.mubr.bf16.mxu1 %v7383_v0  ;;  %v6323_v14 = vld [vmem:[#allocation8 + $0x10] sm:$0xff]  }
 0x2bb   : > { %5553 = vmatprep.subr.bf16.mxu1 %v6281_v28  ;;  %5743 = vmatprep.subr.bf16.mxu0 %v6300_v20 }
 0x2bc   : > { %5728 = vmatmul.mubr.bf16.gmra.mrb[48].mxu0 %v7380_v60 }
 0x2bd   : > { %5744 = vmatpush3.bf16.msra.mxu0 %v6300_v20  ;;  %5731 = vmatprep.mubr.bf16.mxu0 %v7383_v0  ;;  %v6330_v20 = vld [vmem:[#allocation8 + $0x188] sm:$0xff]  }
 0x2be   : > { %5554 = vmatpush3.bf16.msra.mxu1 %v6281_v28  ;;  %5745 = vmatprep.subr.bf16.mxu0 %v6302_v43  ;;  %v6325_v28 = vld [vmem:[#allocation8 + $0x20] sm:$0xff]  }
 0x2bf   : > { %5555 = vmatprep.subr.bf16.mxu1 %v6283_v62 }
 0x2c1   : > { %5540 = vmatmul.mubr.bf16.gmra.mrb[32].mxu1 %v7388_v9  ;;  %5746 = vmatpush3.bf16.msra.mxu0 %v6302_v43  ;;  %v6332_v43 = vld [vmem:[#allocation8 + $0x198] sm:$0xff]  }
 0x2c2   : > { %5556 = vmatpush3.bf16.msra.mxu1 %v6283_v62  ;;  %5559 = vmatprep.mubr.bf16.mxu1 %v7391_v15  ;;  %v6327_v62 = vld [vmem:[#allocation8 + $0x30] sm:$0xff]  }
 0x2c3   : > { %5557 = vmatprep.subr.bf16.mxu1 %v6285_v63  ;;  %5747 = vmatprep.subr.bf16.mxu0 %v6304_v32 }
 0x2c4   : > { %5732 = vmatmul.mubr.bf16.gmra.mrb[52].mxu0 %v7388_v9 }
 0x2c5   : > { %5748 = vmatpush3.bf16.msra.mxu0 %v6304_v32  ;;  %5751 = vmatprep.mubr.bf16.mxu0 %v7391_v15  ;;  %v6336_v32 = vld [vmem:[#allocation8 + $0x1b8] sm:$0xff]  }
 0x2c6   : > { %5558 = vmatpush3.bf16.msra.mxu1 %v6285_v63  ;;  %5749 = vmatprep.subr.bf16.mxu0 %v6306_v5  ;;  %v6329_v63 = vld [vmem:[#allocation8 + $0x180] sm:$0xff]  }
 0x2c7   : > { %5575 = vmatprep.subr.bf16.mxu1 %v6287_v23 }
 0x2c9   : > { %5560 = vmatmul.mubr.bf16.vlgmr.msra.gmra.mrb[20].mxu1 %v7364_v31  ;;  %5750 = vmatpush3.bf16.msra.mxu0 %v6306_v5 }
 0x2ca   : > { %5576 = vmatpush3.bf16.msra.mxu1 %v6287_v23  ;;  %5563 = vmatprep.mubr.bf16.mxu1 %v7368_v50  ;;  %v6331_v23 = vld [vmem:[#allocation8 + $0x190] sm:$0xff]  }
 0x2cb   : > { %5577 = vmatprep.subr.bf16.mxu1 %v6289_v33  ;;  %5767 = vmatprep.subr.bf16.mxu0 %v7402_v54 }
 0x2cc   : > { %5752 = vmatmul.mubr.bf16.vlgmr.msra.gmra.mrb[40].mxu0 %v7364_v31 }
 0x2cd   : > { %5768 = vmatpush3.bf16.msra.mxu0 %v7402_v54  ;;  %5755 = vmatprep.mubr.bf16.mxu0 %v7368_v50 }
 0x2ce   : > { %5578 = vmatpush3.bf16.msra.mxu1 %v6289_v33  ;;  %5769 = vmatprep.subr.bf16.mxu0 %v7407_v1  ;;  %v6334_v33 = vld [vmem:[#allocation8 + $0x1a8] sm:$0xff]  }
 0x2cf   : > { %5579 = vmatprep.subr.bf16.mxu1 %v6291_v4 }
 0x2d1   : > { %5564 = vmatmul.mubr.bf16.gmra.mrb[24].mxu1 %v7370_v52  ;;  %5770 = vmatpush3.bf16.msra.mxu0 %v7407_v1 }
 0x2d2   : > { %5580 = vmatpush3.bf16.msra.mxu1 %v6291_v4  ;;  %5567 = vmatprep.mubr.bf16.mxu1 %v7374_v24 }
 0x2d3   : > { %5581 = vmatprep.subr.bf16.mxu1 %v6293_v46  ;;  %5771 = vmatprep.subr.bf16.mxu0 %v7413_v13 }
 0x2d4   : > { %5756 = vmatmul.mubr.bf16.gmra.mrb[44].mxu0 %v7370_v52 }
 0x2d5   : > { %5772 = vmatpush3.bf16.msra.mxu0 %v7413_v13  ;;  %5759 = vmatprep.mubr.bf16.mxu0 %v7374_v24 }
 0x2d6   : > { %5582 = vmatpush3.bf16.msra.mxu1 %v6293_v46  ;;  %5773 = vmatprep.subr.bf16.mxu0 %v7419_v37 }
 0x2d7   : > { %5583 = vmatprep.subr.bf16.mxu1 %v6295_v42 }
 0x2d9   : > { %5568 = vmatmul.mubr.bf16.gmra.mrb[28].mxu1 %v7376_v19  ;;  %5774 = vmatpush3.bf16.msra.mxu0 %v7419_v37 }
 0x2da   : > { %5584 = vmatpush3.bf16.msra.mxu1 %v6295_v42  ;;  %5571 = vmatprep.mubr.bf16.mxu1 %v7380_v60 }
 0x2db   : > { %5585 = vmatprep.subr.bf16.mxu1 %v6297_v34  ;;  %5775 = vmatprep.subr.bf16.mxu0 %v7425_v26 }
 0x2dc   : > { %5760 = vmatmul.mubr.bf16.gmra.mrb[48].mxu0 %v7376_v19 }
 0x2dd   : > { %5776 = vmatpush3.bf16.msra.mxu0 %v7425_v26  ;;  %5763 = vmatprep.mubr.bf16.mxu0 %v7380_v60 }
 0x2de   : > { %5586 = vmatpush3.bf16.msra.mxu1 %v6297_v34  ;;  %5777 = vmatprep.subr.bf16.mxu0 %v7431_v40 }
 0x2df   : > { %5587 = vmatprep.subr.bf16.mxu1 %v6299_v35 }
 0x2e1   : > { %5572 = vmatmul.mubr.bf16.gmra.mrb[32].mxu1 %v7383_v0  ;;  %5778 = vmatpush3.bf16.msra.mxu0 %v7431_v40 }
 0x2e2   : > { %5588 = vmatpush3.bf16.msra.mxu1 %v6299_v35  ;;  %5591 = vmatprep.mubr.bf16.mxu1 %v7368_v50 }
 0x2e3   : > { %5589 = vmatprep.subr.bf16.mxu1 %v6301_v7  ;;  %5779 = vmatprep.subr.bf16.mxu0 %v7437_v11 }
 0x2e4   : > { %5764 = vmatmul.mubr.bf16.gmra.mrb[52].mxu0 %v7383_v0 }
 0x2e5   : > { %5780 = vmatpush3.bf16.msra.mxu0 %v7437_v11  ;;  %5783 = vmatprep.mubr.bf16.mxu0 %v7368_v50 }
 0x2e6   : > { %5590 = vmatpush3.bf16.msra.mxu1 %v6301_v7  ;;  %5781 = vmatprep.subr.bf16.mxu0 %v7443_v29 }
 0x2e7   : > { %5607 = vmatprep.subr.bf16.mxu1 %v6303_v8 }
 0x2e9   : > { %5592 = vmatmul.mubr.bf16.vlgmr.msra.gmra.mrb[20].mxu1 %v7370_v52  ;;  %5782 = vmatpush3.bf16.msra.mxu0 %v7443_v29 }
 0x2ea   : > { %5608 = vmatpush3.bf16.msra.mxu1 %v6303_v8  ;;  %5595 = vmatprep.mubr.bf16.mxu1 %v7374_v24 }
 0x2eb   : > { %5609 = vmatprep.subr.bf16.mxu1 %v6305_v41 }
 0x2ec   : > { %5784 = vmatmul.mubr.bf16.vlgmr.msra.gmra.mrb[40].mxu0 %v7370_v52 }
 0x2ed   : > { %5787 = vmatprep.mubr.bf16.mxu0 %v7374_v24 }
 0x2ee   : > { %5610 = vmatpush3.bf16.msra.mxu1 %v6305_v41 }
 0x2ef   : > { %5611 = vmatprep.subr.bf16.mxu1 %v6307_v45 }
 0x2f1   : > { %5596 = vmatmul.mubr.bf16.gmra.mrb[24].mxu1 %v7376_v19 }
 0x2f2   : > { %5612 = vmatpush3.bf16.msra.mxu1 %v6307_v45  ;;  %5599 = vmatprep.mubr.bf16.mxu1 %v7380_v60 }
 0x2f3   : > { %5613 = vmatprep.subr.bf16.mxu1 %v6309_v61 }
 0x2f4   : > { %5788 = vmatmul.mubr.bf16.gmra.mrb[44].mxu0 %v7376_v19 }
 0x2f5   : > { %5791 = vmatprep.mubr.bf16.mxu0 %v7380_v60 }
 0x2f6   : > { %5614 = vmatpush3.bf16.msra.mxu1 %v6309_v61 }
 0x2f7   : > { %5615 = vmatprep.subr.bf16.mxu1 %v6311_v47 }
 0x2f9   : > { %5600 = vmatmul.mubr.bf16.gmra.mrb[28].mxu1 %v7383_v0 }
 0x2fa   : > { %5616 = vmatpush3.bf16.msra.mxu1 %v6311_v47  ;;  %5603 = vmatprep.mubr.bf16.mxu1 %v7388_v9 }
 0x2fb   : > { %5617 = vmatprep.subr.bf16.mxu1 %v6313_v44 }
 0x2fc   : > { %5792 = vmatmul.mubr.bf16.gmra.mrb[48].mxu0 %v7383_v0 }
 0x2fe   : > { %5618 = vmatpush3.bf16.msra.mxu1 %v6313_v44 }
 0x2ff   : > { %5619 = vmatprep.subr.bf16.mxu1 %v6315_v58 }
 0x301   : > { %5604 = vmatmul.mubr.bf16.gmra.mrb[32].mxu1 %v7456_v17 }
 0x302   : > { %5620 = vmatpush3.bf16.msra.mxu1 %v6315_v58  ;;  %5623 = vmatprep.mubr.bf16.mxu1 %v7364_v31 }
 0x303   : > { %5621 = vmatprep.subr.bf16.mxu1 %v6317_v16 }
 0x306   : > { %5622 = vmatpush3.bf16.msra.mxu1 %v6317_v16 }
 0x307   : > { %5639 = vmatprep.subr.bf16.mxu1 %v6319_v25 }
 0x309   : > { %5624 = vmatmul.mubr.bf16.vlgmr.msra.gmra.mrb[36].mxu1 %v7368_v50 }
 0x30a   : > { %5640 = vmatpush3.bf16.msra.mxu1 %v6319_v25  ;;  %5627 = vmatprep.mubr.bf16.mxu1 %v7370_v52 }
 0x30b   : > { %5641 = vmatprep.subr.bf16.mxu1 %v6321_v57 }
 0x30e   : > { %5642 = vmatpush3.bf16.msra.mxu1 %v6321_v57 }
 0x30f   : > { %5643 = vmatprep.subr.bf16.mxu1 %v6323_v14 }
 0x311   : > { %5628 = vmatmul.mubr.bf16.gmra.mrb[40].mxu1 %v7374_v24 }
 0x312   : > { %5644 = vmatpush3.bf16.msra.mxu1 %v6323_v14  ;;  %5631 = vmatprep.mubr.bf16.mxu1 %v7376_v19 }
 0x313   : > { %5645 = vmatprep.subr.bf16.mxu1 %v6324_v6 }
 0x316   : > { %5646 = vmatpush3.bf16.msra.mxu1 %v6324_v6 }
 0x317   : > { %5647 = vmatprep.subr.bf16.mxu1 %v6325_v28 }
 0x319   : > { %5632 = vmatmul.mubr.bf16.gmra.mrb[44].mxu1 %v7380_v60 }
 0x31a   : > { %5648 = vmatpush3.bf16.msra.mxu1 %v6325_v28  ;;  %5635 = vmatprep.mubr.bf16.mxu1 %v7383_v0 }
 0x31b   : > { %5649 = vmatprep.subr.bf16.mxu1 %v6326_v56 }
 0x31e   : > { %5650 = vmatpush3.bf16.msra.mxu1 %v6326_v56 }
 0x31f   : > { %5651 = vmatprep.subr.bf16.mxu1 %v6327_v62 }
 0x321   : > { %5636 = vmatmul.mubr.bf16.gmra.mrb[48].mxu1 %v7388_v9 }
 0x322   : > { %5652 = vmatpush3.bf16.msra.mxu1 %v6327_v62  ;;  %5655 = vmatprep.mubr.bf16.mxu1 %v7391_v15  ;;  %v6333_v15 = vld [vmem:[#allocation8 + $0x1a0] sm:$0xff]  }
 0x323   : > { %5653 = vmatprep.subr.bf16.mxu1 %v6328_v36 }
 0x326   : > { %5654 = vmatpush3.bf16.msra.mxu1 %v6328_v36 }
 0x327   : > { %5671 = vmatprep.subr.bf16.mxu1 %v6329_v63 }
 0x329   : > { %5656 = vmatmul.mubr.bf16.vlgmr.msra.gmra.mrb[36].mxu1 %v7364_v31  ;;  %v6335_v31 = vld [vmem:[#allocation8 + $0x1b0] sm:$0xff]  }
 0x32a   : > { %5672 = vmatpush3.bf16.msra.mxu1 %v6329_v63  ;;  %5659 = vmatprep.mubr.bf16.mxu1 %v7368_v50 }
 0x32b   : > { %5673 = vmatprep.subr.bf16.mxu1 %v6330_v20 }
 0x32e   : > { %5674 = vmatpush3.bf16.msra.mxu1 %v6330_v20 }
 0x32f   : > { %5675 = vmatprep.subr.bf16.mxu1 %v6331_v23 }
 0x331   : > { %5660 = vmatmul.mubr.bf16.gmra.mrb[40].mxu1 %v7370_v52 }
 0x332   : > { %5676 = vmatpush3.bf16.msra.mxu1 %v6331_v23  ;;  %5663 = vmatprep.mubr.bf16.mxu1 %v7374_v24 }
 0x333   : > { %5677 = vmatprep.subr.bf16.mxu1 %v6332_v43 }
 0x336   : > { %5678 = vmatpush3.bf16.msra.mxu1 %v6332_v43 }
 0x337   : > { %5679 = vmatprep.subr.bf16.mxu1 %v6333_v15 }
 0x339   : > { %5664 = vmatmul.mubr.bf16.gmra.mrb[44].mxu1 %v7376_v19 }
 0x33a   : > { %5680 = vmatpush3.bf16.msra.mxu1 %v6333_v15  ;;  %5667 = vmatprep.mubr.bf16.mxu1 %v7380_v60 }
 0x33b   : > { %5681 = vmatprep.subr.bf16.mxu1 %v6334_v33 }
 0x33e   : > { %5682 = vmatpush3.bf16.msra.mxu1 %v6334_v33 }
 0x33f   : > { %5683 = vmatprep.subr.bf16.mxu1 %v6335_v31 }
 0x341   : > { %5668 = vmatmul.mubr.bf16.gmra.mrb[48].mxu1 %v7383_v0 }
 0x342   : > { %5684 = vmatpush3.bf16.msra.mxu1 %v6335_v31  ;;  %5687 = vmatprep.mubr.bf16.mxu1 %v7368_v50 }
 0x343   : > { %5685 = vmatprep.subr.bf16.mxu1 %v6336_v32 }
 0x346   : > { %5686 = vmatpush3.bf16.msra.mxu1 %v6336_v32 }
 0x347   : > { %5799 = vmatprep.subr.bf16.mxu1 %v7402_v54 }
 0x349   : > { %5688 = vmatmul.mubr.bf16.vlgmr.msra.gmra.mrb[36].mxu1 %v7370_v52 }
 0x34a   : > { %5807 = vmatpush3.bf16.msra.mxu1 %v7402_v54  ;;  %5691 = vmatprep.mubr.bf16.mxu1 %v7374_v24 }
 0x34b   : > { %5800 = vmatprep.subr.bf16.mxu1 %v7407_v1 }
 0x34e   : > { %5808 = vmatpush3.bf16.msra.mxu1 %v7407_v1 }
 0x34f   : > { %5801 = vmatprep.subr.bf16.mxu1 %v7413_v13 }
 0x351   : > { %5692 = vmatmul.mubr.bf16.gmra.mrb[40].mxu1 %v7376_v19 }
 0x352   : > { %5809 = vmatpush3.bf16.msra.mxu1 %v7413_v13  ;;  %5695 = vmatprep.mubr.bf16.mxu1 %v7380_v60 }
 0x353   : > { %5802 = vmatprep.subr.bf16.mxu1 %v7419_v37 }
 0x356   : > { %5810 = vmatpush3.bf16.msra.mxu1 %v7419_v37 }
 0x357   : > { %5803 = vmatprep.subr.bf16.mxu1 %v7425_v26 }
 0x359   : > { %5696 = vmatmul.mubr.bf16.gmra.mrb[44].mxu1 %v7383_v0 }
 0x35a   : > { %5811 = vmatpush3.bf16.msra.mxu1 %v7425_v26  ;;  %5699 = vmatprep.mubr.bf16.mxu1 %v7388_v9 }
 0x35b   : > { %5804 = vmatprep.subr.bf16.mxu1 %v7431_v40 }
 0x35e   : > { %5812 = vmatpush3.bf16.msra.mxu1 %v7431_v40 }
 0x35f   : > { %5805 = vmatprep.subr.bf16.mxu1 %v7437_v11 }
 0x361   : > { %5700 = vmatmul.mubr.bf16.gmra.mrb[48].mxu1 %v7456_v17 }
 0x362   : > { %5813 = vmatpush3.bf16.msra.mxu1 %v7437_v11  ;;  %5795 = vmatprep.mubr.bf16.mxu1 %v7388_v9 }
 0x363   : > { %5806 = vmatprep.subr.bf16.mxu1 %v7443_v29 }
 0x366   : > { %5814 = vmatpush3.bf16.msra.mxu1 %v7443_v29 }
 0x369   : > { %5796 = vmatmul.mubr.bf16.vlgmr.msra.gmra.mrb[52].mxu1 %v7456_v17 }
 0x3b7   : > { %v7512_v60 = vpop.f32.mrb[52].mxu0 }
 0x3b8   : > { %v7514_v0 = vpop.f32.mrb[53].mxu0 }
 0x3b9   : > { %7979 = vst [vmem:[#allocation20_spill] sm:$0xff] %v7514_v0  ;;  %v7516_v4 = vpop.f32.mrb[54].mxu0 }
 0x3ba   : > { %7980 = vst [vmem:[#allocation21_spill] sm:$0xff] %v7516_v4  ;;  %v7520_v5 = vpop.f32.mrb[55].mxu0 }
 0x3bb   : > { %7981 = vst [vmem:[#allocation22_spill] sm:$0xff] %v7520_v5 }
 0x3bc   : > { %v7504_v50 = vpop.f32.mrb[20].mxu1 }
 0x3bd   : > { %v7506_v52 = vpop.f32.mrb[21].mxu1 }
 0x3be   : > { %v7508_v24 = vpop.f32.mrb[22].mxu1 }
 0x3bf   : > { %v7510_v19 = vpop.f32.mrb[23].mxu1  ;;  %v5785_v1 = vpop.f32.mrb[40].mxu0 }
 0x3c0   : > { %v4099_v34 = vrot.slane %v5785_v1, 1  ;;  %v7528_v13 = vpop.f32.mrb[41].mxu0 }
 0x3c1   : > { %7982 = vst [vmem:[#allocation23_spill] sm:$0xff] %v7528_v13  ;;  %v7905_v35 = vrot.slane %v7528_v13, 1  ;;  %v5786_v37 = vpop.f32.mrb[42].mxu0  ;;  %v7631_v13 = vld [vmem:[%s6832_s30 + $0x30] sm:$0xff]  }
 0x3c2   : > { %v4100_v26 = vrot.slane %v5786_v37, 1  ;;  %v3973_v8 = vpop.f32.mrb[43].mxu0 }
 0x3c3   : > { %v4098_v41 = vrot.slane %v3973_v8, 1 }
 0x3c4   : > { %v7518_v9 = vpop.f32.mrb[24].mxu1  ;;  %v7539_v45 = vsel %vm7983_vm7, %v4099_v34, %v4100_v26  ;;  %vm7988_vm7 = vmmov %vm7986_vm0 }
 0x3c5   : > { %v7522_v46 = vpop.f32.mrb[25].mxu1  ;;  %v4126_v61 = vsel %vm7984_vm9, %v4098_v41, %v4099_v34  ;;  %v7549_v47 = vsel %vm7985_vm11, %v7905_v35, %v4098_v41  ;;  %vm7989_vm9 = vmmov %vm7986_vm0  ;;  %v7599_v35 = vld [vmem:[%s6832_s30 + $0x10] sm:$0xff]  }
 0x3c6   : > { %v7524_v54 = vpop.f32.mrb[26].mxu1  ;;  %vm7991_vm11 = vmmov %vm7986_vm0 }
 0x3c7   : > { %v7526_v42 = vpop.f32.mrb[27].mxu1  ;;  %v5789_v44 = vpop.f32.mrb[44].mxu0 }
 0x3c8   : > { %v4103_v58 = vrot.slane %v5789_v44, 1  ;;  %v3986_v17 = vpop.f32.mrb[45].mxu0 }
 0x3c9   : > { %v4101_v16 = vrot.slane %v3986_v17, 1  ;;  %v5790_v25 = vpop.f32.mrb[46].mxu0 }
 0x3ca   : > { %v4104_v14 = vrot.slane %v5790_v25, 1  ;;  %v3989_v6 = vpop.f32.mrb[47].mxu0 }
 0x3cb   : > { %v4124_v56 = vsel %vm7986_vm0, %v4100_v26, %v4101_v16  ;;  %v4102_v62 = vrot.slane %v3989_v6, 1 }
 0x3cc   : > { %v7531_v7 = vpop.f32.mrb[28].mxu1  ;;  %v7561_v63 = vsel %vm7987_vm6, %v4103_v58, %v4104_v14  ;;  %vm7992_vm6 = vmmov %vm7986_vm0  ;;  %v4132_v21 = vsel %vm7200_vm13, 0.0, %v4124_v56 }
 0x3cd   : > { %v7533_v40 = vpop.f32.mrb[29].mxu1  ;;  %v7567_v23 = vsel %vm7988_vm7, %v4102_v62, %v4103_v58  ;;  %v7571_v43 = vsel %vm7989_vm9, %v4101_v16, %v4102_v62  ;;  %vm7993_vm7 = vmmov %vm7986_vm0  ;;  %v4867_v62 = vld [vmem:[%s6832_s30 + $0x18] sm:$0xff]   ;;  %vm7994_vm9 = vcmp.lt.s32.totalorder %v7014_v39, 1 }
 0x3ce   : > { %v7535_v11 = vpop.f32.mrb[30].mxu1  ;;  %v4800_v56 = vunpack.c.l.bf16 %v4867_v62 }
 0x3cf   : > { %v7541_v29 = vpop.f32.mrb[31].mxu1  ;;  %v5793_v15 = vpop.f32.mrb[48].mxu0 }
 0x3d0   : > { %v4107_v33 = vrot.slane %v5793_v15, 1  ;;  %v4002_v31 = vpop.f32.mrb[49].mxu0 }
 0x3d1   : > { %v4105_v32 = vrot.slane %v4002_v31, 1  ;;  %v7573_v1 = vpop.f32.mrb[50].mxu0 }
 0x3d2   : > { %7990 = vst [vmem:[#allocation24_spill] sm:$0xff] %v7573_v1  ;;  %v7906_v34 = vrot.slane %v7573_v1, 1  ;;  %v4005_v37 = vpop.f32.mrb[51].mxu0 }
 0x3d3   : > { %v7578_v26 = vsel %vm7991_vm11, %v4104_v14, %v4105_v32  ;;  %v4106_v8 = vrot.slane %v4005_v37, 1  ;;  %vm7995_vm11 = vmmov %vm7994_vm9 }
 0x3d4   : > { %v7551_v57 = vpop.f32.mrb[32].mxu1  ;;  %v7584_v41 = vsel %vm7986_vm0, %v4107_v33, %v7906_v34  ;;  %vm7996_vm0 = vmmov %vm7994_vm9  ;;  %v4136_v10 = vsel %vm7228_vm15, 0.0, %v7578_v26 }
 0x3d5   : > { %v7553_v28 = vpop.f32.mrb[33].mxu1  ;;  %v7588_v44 = vsel %vm7992_vm6, %v4106_v8, %v4107_v33  ;;  %v7592_v58 = vsel %vm7993_vm7, %v4105_v32, %v4106_v8  ;;  %v4801_v8 = vunpack.c.h.bf16 %v4867_v62  ;;  %vm8000_vm13 = vmmov %vm7996_vm0 }
 0x3d6   : > { %v7557_v36 = vpop.f32.mrb[34].mxu1  ;;  %vm8003_vm15 = vmmov %vm7996_vm0 }
 0x3d7   : > { %v7563_v20 = vpop.f32.mrb[35].mxu1  ;;  %vm8008_vm6 = vmmov %vm7996_vm0 }
 0x3d8   : > { %vm8011_vm7 = vmmov %vm7996_vm0 }
 0x41c   : > { %v5689_v17 = vpop.f32.mrb[36].mxu1 }
 0x41d   : > { %v7594_v16 = vpop.f32.mrb[37].mxu1  ;;  %v4051_v14 = vrot.slane %v5689_v17, 7 }
 0x41e   : > { %v5690_v25 = vpop.f32.mrb[38].mxu1  ;;  %v7909_v31 = vrot.slane %v7594_v16, 7 }
 0x41f   : > { %v4052_v6 = vrot.slane %v5690_v25, 7  ;;  %v3471_v15 = vpop.f32.mrb[39].mxu1  ;;  %v7611_v25 = vld [vmem:[%s6832_s30 + $0x20] sm:$0xff]  }
 0x420   : > { %v4050_v37 = vrot.slane %v3471_v15, 7  ;;  %v7614_v15 = vld [vmem:[%s6832_s30 + $0x28] sm:$0xff]   ;;  %v8005_v38 = vunpack.c.h.bf16 %v7611_v25 }
 0x421   : > { %v4077_v33 = vsel %vm7994_vm9, %v4051_v14, %v4052_v6  ;;  %v4809_v30 = vunpack.c.h.bf16 %v7614_v15  ;;  %vm8012_vm9 = vnez %v7951_v53  ;;  %v4873_v53 = vld [vmem:[%s6832_s30 + $0x48] sm:$0xff]  }
 0x422   : > { %v4148_v32 = vadd.f32 %v7508_v24, %v4077_v33  ;;  %v4078_v34 = vsel %vm7995_vm11, %v4050_v37, %v4051_v14  ;;  %v4079_v17 = vsel %vm7996_vm0, %v7909_v31, %v4050_v37  ;;  %v7621_v24 = vld [vmem:[%s7884_s3 + $0x2] ss:$0 sm:$0xff]  ;;  %v4130_v37 = vsel %vm7170_vm12, 0.0, %v4126_v61  ;;  %vm7998_vm12 = vmmov %vm7996_vm0 }
 0x423   : > { %v4083_v14 = vsel %vm7024_vm1, 0.0, %v4078_v34  ;;  %v4146_v33 = vadd.f32 %v4079_v17, %v7510_v19  ;;  %v4804_v17 = vunpack.c.l.bf16 %v7611_v25  ;;  %vm7997_vm1 = vmmov %vm7996_vm0 }
 0x424   : > { %v4164_v31 = vadd.f32 %v4148_v32, %v4132_v21  ;;  %v4147_v2 = vadd.f32 %v7504_v50, %v4083_v14  ;;  %v5693_v48 = vpop.f32.mrb[40].mxu1  ;;  %v4808_v14 = vunpack.c.l.bf16 %v7614_v15  ;;  %vm8013_vm11 = vmmov %vm7996_vm0 }
 0x425   : > { %v4162_v34 = vadd.f32 %v4146_v33, %v4130_v37  ;;  %v3484_v19 = vpop.f32.mrb[41].mxu1  ;;  %v4055_v1 = vrot.slane %v5693_v48, 7 }
 0x426   : > { %v4185_v61 = vmul.f32 %v7621_v24, %v4164_v31  ;;  %v4163_v50 = vadd.f32 %v4147_v2, %v7539_v45  ;;  %v4053_v62 = vrot.slane %v3484_v19, 7  ;;  %v5694_v32 = vpop.f32.mrb[42].mxu1  ;;  %v4816_v19 = vunpack.c.l.bf16 %v7645_v27 }
 0x427   : > { %v4056_v5 = vrot.slane %v5694_v32, 7  ;;  %v3487_v33 = vpop.f32.mrb[43].mxu1  ;;  %v4796_v32 = vunpack.c.l.bf16 %v7599_v35 }
 0x428   : > { %v4206_v0 = vadd.f32 %v7636_v55, %v4185_v61  ;;  %v4184_v21 = vmul.f32 %v7621_v24, %v4163_v50  ;;  %v4076_v45 = vsel %vm7997_vm1, %v4052_v6, %v4053_v62  ;;  %v4054_v31 = vrot.slane %v3487_v33, 7 }
 0x429   : > { %v4085_v2 = vsel %vm7046_vm2, 0.0, %v4076_v45  ;;  %v4073_v48 = vsel %vm7998_vm12, %v4055_v1, %v4056_v5  ;;  %v4134_v6 = vsel %vm7204_vm14, 0.0, %v7567_v23  ;;  %vm7999_vm2 = vmmov %vm7996_vm0  ;;  %v7677_v45 = vmul.f32 %v7621_v24, %v4162_v34 }
 0x42a   : > { %v4254_v37 = vadd.f32 %v4801_v8, %v4206_v0  ;;  %v4205_v4 = vadd.f32 %v7636_v55, %v4184_v21  ;;  %v4149_v61 = vadd.f32 %v4085_v2, %v7522_v46  ;;  %v4152_v50 = vadd.f32 %v7524_v54, %v4073_v48  ;;  %vm8002_vm14 = vmmov %vm7996_vm0 }
 0x42b   : > { %v4074_v33 = vsel %vm7999_vm2, %v4054_v31, %v4055_v1  ;;  %v4075_v0 = vsel %vm8000_vm13, %v4053_v62, %v4054_v31  ;;  %v4138_v46 = vsel %vm7234_vm8, 0.0, %v7588_v44  ;;  %vm8004_vm8 = vmmov %vm7996_vm0  ;;  %vm8015_vm1 = vnez %v7949_v22 }
 0x42c   : > { %v4253_v8 = vadd.f32 %v4800_v56, %v4205_v4  ;;  %v4165_v54 = vadd.f32 %v4149_v61, %v7571_v43  ;;  %v4168_v21 = vadd.f32 %v4152_v50, %v4136_v10  ;;  %v5697_v3 = vpop.f32.mrb[44].mxu1  ;;  %v4270_v23 = vmax.f32 %v4254_v37, 0.0 }
 0x42d   : > { %v4087_v51 = vsel %vm7052_vm3, 0.0, %v4074_v33  ;;  %v4150_v1 = vadd.f32 %v4075_v0, %v7526_v42  ;;  %v3500_v26 = vpop.f32.mrb[45].mxu1  ;;  %v4059_v56 = vrot.slane %v5697_v3, 7  ;;  %vm8001_vm3 = vmmov %vm7996_vm0  ;;  %vm8022_vm12 = vcmp.lt.s32.totalorder %v7014_v39, 7 }
 0x42e   : > { %v4269_v62 = vmax.f32 %v4253_v8, 0.0  ;;  %v4186_v31 = vmul.f32 %v7621_v24, %v4165_v54  ;;  %v4189_v59 = vmul.f32 %v7621_v24, %v4168_v21  ;;  %v4151_v4 = vadd.f32 %v7518_v9, %v4087_v51  ;;  %v5698_v43 = vpop.f32.mrb[46].mxu1  ;;  %vm8023_vm2 = vmmov %vm8022_vm12 }
 0x42f   : > { %v4166_v44 = vadd.f32 %v4150_v1, %v4134_v6  ;;  %v4057_v37 = vrot.slane %v3500_v26, 7  ;;  %v4060_v34 = vrot.slane %v5698_v43, 7  ;;  %v3503_v2 = vpop.f32.mrb[47].mxu1  ;;  %vm8026_vm13 = vmmov %vm8023_vm2 }
 0x430   : > { %v4834_v48 = vpack.c.bf16 %v4270_v23, %v4269_v62  ;;  %v4207_v18 = vadd.f32 %v7636_v55, %v4186_v31  ;;  %v4210_v42 = vadd.f32 %v7636_v55, %v4189_v59  ;;  %v4167_v61 = vadd.f32 %v4151_v4, %v7561_v63 }
 0x431   : > { %v4187_v50 = vmul.f32 %v7621_v24, %v4166_v44  ;;  %v4072_v10 = vsel %vm8001_vm3, %v4056_v5, %v4057_v37  ;;  %v4069_v9 = vsel %vm8002_vm14, %v4059_v56, %v4060_v34  ;;  %v4058_v6 = vrot.slane %v3503_v2, 7  ;;  %vm8030_vm14 = vmmov %vm8023_vm2 }
 0x432   : > { %4874 = vst [vmem:[%s7360_s8 + $0x8] sm:$0xff] %v4834_v48   ;;  %v4255_v33 = vadd.f32 %v4804_v17, %v4207_v18  ;;  %v4258_v0 = vadd.f32 %v4809_v30, %v4210_v42  ;;  %v4188_v8 = vmul.f32 %v7621_v24, %v4167_v61  ;;  %v4089_v54 = vsel %vm7076_vm4, 0.0, %v4072_v10  ;;  %vm8006_vm4 = vmmov %vm7996_vm0 }
 0x433   : > { %v4208_v21 = vadd.f32 %v7636_v55, %v4187_v50  ;;  %v4153_v63 = vadd.f32 %v4089_v54, %v7533_v40  ;;  %v7700_v3 = vadd.f32 %v7535_v11, %v4069_v9  ;;  %v4070_v5 = vsel %vm8003_vm15, %v4058_v6, %v4059_v56  ;;  %vm8031_vm15 = vmmov %vm8023_vm2 }
 0x434   : > { %v4271_v23 = vmax.f32 %v4255_v33, 0.0  ;;  %v4274_v51 = vmax.f32 %v4258_v0, 0.0  ;;  %v4209_v17 = vadd.f32 %v7636_v55, %v4188_v8  ;;  %v4071_v30 = vsel %vm8004_vm8, %v4057_v37, %v4058_v6  ;;  %v5701_v1 = vpop.f32.mrb[48].mxu1 }
 0x435   : > { %v4256_v26 = vadd.f32 %v8005_v38, %v4208_v21  ;;  %v4169_v62 = vadd.f32 %v4153_v63, %v7592_v58  ;;  %v4091_v40 = vsel %vm7082_vm5, 0.0, %v4070_v5  ;;  %v4154_v11 = vadd.f32 %v4071_v30, %v7541_v29  ;;  %v3516_v31 = vpop.f32.mrb[49].mxu1 }
 0x436   : > { %v4257_v59 = vadd.f32 %v4808_v14, %v4209_v17  ;;  %v4155_v4 = vadd.f32 %v7531_v7, %v4091_v40  ;;  %v4063_v43 = vrot.slane %v5701_v1, 7  ;;  %v4061_v44 = vrot.slane %v3516_v31, 7  ;;  %v5702_v56 = vpop.f32.mrb[50].mxu1  ;;  %v8016_v40 = vld [vmem:[#allocation20_spill] sm:$0xff] }
 0x437   : > { %v4272_v37 = vmax.f32 %v4256_v26, 0.0  ;;  %v4190_v25 = vmul.f32 %v7621_v24, %v4169_v62  ;;  %v4170_v2 = vadd.f32 %v4154_v11, %v4138_v46  ;;  %v4064_v58 = vrot.slane %v5702_v56, 7  ;;  %v3519_v48 = vpop.f32.mrb[51].mxu1  ;;  %v8018_v56 = vld [vmem:[#allocation22_spill] sm:$0xff] }
 0x438   : > { %v4273_v49 = vmax.f32 %v4257_v59, 0.0  ;;  %v4171_v18 = vadd.f32 %v4155_v4, %v7584_v41  ;;  %v4068_v29 = vsel %vm8006_vm4, %v4060_v34, %v4061_v44  ;;  %v4062_v15 = vrot.slane %v3519_v48, 7  ;;  %v4872_v59 = vld [vmem:[%s6832_s30 + $0x40] sm:$0xff]   ;;  %s7811_s30 = scalar_lea.hbm %s8034_s28, %s4770_s22 }
 0x439   : > { %v4839_v14 = vpack.c.bf16 %v4272_v37, %v4271_v23  ;;  %v4211_v7 = vadd.f32 %v7636_v55, %v4190_v25  ;;  %v4191_v42 = vmul.f32 %v7621_v24, %v4170_v2  ;;  %vm8007_vm5 = vnez %v7947_v12 }
 0x43a   : > { %v4093_v61 = vsel %vm8007_vm5, 0.0, %v4068_v29  ;;  %v4844_v50 = vpack.c.bf16 %v4274_v51, %v4273_v49  ;;  %v4065_v10 = vsel %vm8008_vm6, %v4063_v43, %v4064_v58  ;;  %v4817_v41 = vunpack.c.h.bf16 %v7645_v27  ;;  %v8020_v29 = vld [vmem:[#allocation24_spill] sm:$0xff] }
 0x43b   : > { %v4157_v46 = vadd.f32 %v4093_v61, %v7553_v28  ;;  %4875 = vst [vmem:[%s7360_s8 + $0x10] sm:$0xff] %v4839_v14   ;;  %v8009_v34 = vunpack.c.l.bf16 %v7631_v13  ;;  %v4212_v6 = vadd.f32 %v7636_v55, %v4191_v42  ;;  %v8010_v33 = vrot.slane %v7594_v16, 7  ;;  %v8024_v42 = vld [vmem:[#allocation23_spill] sm:$0xff] }
 0x43c   : > { %v4160_v0 = vadd.f32 %v7557_v36, %v4065_v10  ;;  %v4204_v28 = vadd.f32 %v7636_v55, %v7677_v45  ;;  %4876 = vst [vmem:[%s7360_s8 + $0x18] sm:$0xff] %v4844_v50   ;;  %v4066_v54 = vsel %vm8013_vm11, %v4062_v15, %v4063_v43  ;;  %v4067_v21 = vsel %vm7996_vm0, %v4061_v44, %v4062_v15  ;;  %v5797_v63 = vpop.f32.mrb[52].mxu1  ;;  %v8027_v10 = vld [vmem:[#allocation17_spill] sm:$0xff] }
 0x43d   : > { %v4259_v9 = vadd.f32 %v8009_v34, %v4211_v7  ;;  %v4080_v12 = vsel %vm8011_vm7, %v4064_v58, %v8010_v33  ;;  %v8014_v5 = vunpack.c.h.bf16 %v7631_v13  ;;  %v4095_v45 = vsel %vm8015_vm1, 0.0, %v4066_v54  ;;  %v4018_v51 = vpop.f32.mrb[53].mxu1 }
 0x43e   : > { %v4081_v8 = vsel %vm8012_vm9, 0.0, %v4080_v12  ;;  %v4192_v17 = vmul.f32 %v7621_v24, %v4171_v18  ;;  %v4158_v30 = vadd.f32 %v4067_v21, %v7563_v20  ;;  %v4159_v1 = vadd.f32 %v7551_v57, %v4095_v45  ;;  %v5798_v26 = vpop.f32.mrb[54].mxu1 }
 0x43f   : > { %v4275_v16 = vmax.f32 %v4259_v9, 0.0  ;;  %v4260_v23 = vadd.f32 %v8014_v5, %v4212_v6  ;;  %v4145_v36 = vadd.f32 %v4081_v8, %v7506_v52  ;;  %v5815_v38 = vadd.f32 %v5797_v63, %v7512_v60  ;;  %v8017_v52 = vld [vmem:[#allocation21_spill] sm:$0xff]  ;;  %v4021_v31 = vpop.f32.mrb[55].mxu1  ;;  %v8032_v5 = vld [vmem:[#allocation18_spill] sm:$0xff] }
 0x440   : > { %v5816_v11 = vadd.f32 %v4018_v51, %v8016_v40  ;;  %v5817_v22 = vadd.f32 %v5798_v26, %v8017_v52  ;;  %v4824_v43 = vunpack.c.l.bf16 %v4873_v53  ;;  %v4825_v44 = vunpack.c.h.bf16 %v4873_v53 }
 0x441   : > { %v4276_v62 = vmax.f32 %v4260_v23, 0.0  ;;  %v4161_v13 = vadd.f32 %v4145_v36, %v7549_v47  ;;  %v4111_v4 = vrot.slane %v5815_v38, 1  ;;  %v5818_v20 = vadd.f32 %v4021_v31, %v8018_v56 }
 0x442   : > { %v4109_v60 = vrot.slane %v5816_v11, 1  ;;  %v4112_v25 = vrot.slane %v5817_v22, 1  ;;  %v8019_v2 = vunpack.c.h.bf16 %v7599_v35  ;;  %v4213_v58 = vadd.f32 %v7636_v55, %v4192_v17 }
 0x443   : > { %v4849_v37 = vpack.c.bf16 %v4276_v62, %v4275_v16  ;;  %v4182_v57 = vmul.f32 %v7621_v24, %v4161_v13  ;;  %v4110_v48 = vrot.slane %v5818_v20, 1  ;;  %v4820_v49 = vunpack.c.l.bf16 %v4872_v59 }
 0x444   : > { %v4252_v47 = vadd.f32 %v8019_v2, %v4204_v28  ;;  %v8021_v15 = vrot.slane %v8020_v29, 1  ;;  %v4113_v7 = vsel %vm8023_vm2, %v4111_v4, %v4112_v25  ;;  %v8025_v61 = vrot.slane %v8024_v42, 1 }
 0x445   : > { %4877 = vst [vmem:[%s7360_s8 + $0x20] sm:$0xff] %v4849_v37   ;;  %v4203_v18 = vadd.f32 %v7636_v55, %v4182_v57  ;;  %vm8028_vm3 = vnez %v8027_v10  ;;  %v4175_v33 = vadd.f32 %v4159_v1, %v4113_v7  ;;  %v4114_v12 = vsel %vm8030_vm14, %v4110_v48, %v4111_v4 }
 0x446   : > { %v4116_v14 = vsel %vm8022_vm12, %v8021_v15, %v4109_v60  ;;  %v4128_v50 = vsel %vm8026_vm13, %v4112_v25, %v8025_v61  ;;  %v4115_v21 = vsel %vm8031_vm15, %v4109_v60, %v4110_v48  ;;  %v4268_v63 = vmax.f32 %v4252_v47, 0.0 }
 0x447   : > { %v4140_v34 = vsel %vm8028_vm3, 0.0, %v4116_v14  ;;  %v4144_v6 = vsel %vm7307_vm10, 0.0, %v4128_v50  ;;  %v4251_v28 = vadd.f32 %v4796_v32, %v4203_v18  ;;  %v4196_v16 = vmul.f32 %v7621_v24, %v4175_v33 }
 0x448   : > { %v4172_v8 = vadd.f32 %v7700_v3, %v4140_v34  ;;  %v4176_v54 = vadd.f32 %v4160_v0, %v4144_v6  ;;  %vm8033_vm8 = vnez %v8032_v5  ;;  %v4173_v36 = vadd.f32 %v4157_v46, %v4115_v21 }
 0x449   : > { %v4142_v23 = vsel %vm8033_vm8, 0.0, %v4114_v12  ;;  %v4267_v45 = vmax.f32 %v4251_v28, 0.0  ;;  %v4261_v39 = vadd.f32 %v4816_v19, %v4213_v58  ;;  %v4217_v3 = vadd.f32 %v7636_v55, %v4196_v16 }
 0x44a   : > { %v4193_v51 = vmul.f32 %v7621_v24, %v4172_v8  ;;  %v4197_v35 = vmul.f32 %v7621_v24, %v4176_v54  ;;  %v4174_v32 = vadd.f32 %v4158_v30, %v4142_v23  ;;  %v4194_v0 = vmul.f32 %v7621_v24, %v4173_v36 }
 0x44b   : > { %v4821_v53 = vunpack.c.h.bf16 %v4872_v59  ;;  %v4829_v17 = vpack.c.bf16 %v4268_v63, %v4267_v45  ;;  %v4265_v26 = vadd.f32 %v4824_v43, %v4217_v3  ;;  %v4277_v52 = vmax.f32 %v4261_v39, 0.0 }
 0x44c   : > { %v4214_v46 = vadd.f32 %v7636_v55, %v4193_v51  ;;  %v4218_v1 = vadd.f32 %v7636_v55, %v4197_v35  ;;  %v4195_v38 = vmul.f32 %v7621_v24, %v4174_v32  ;;  %v4215_v30 = vadd.f32 %v7636_v55, %v4194_v0 }
 0x44d   : > { %4830 = vst [vmem:[%s7360_s8] sm:$0xff] %v4829_v17   ;;  %v4281_v40 = vmax.f32 %v4265_v26, 0.0 }
 0x44e   : > { %v4262_v19 = vadd.f32 %v4817_v41, %v4214_v46  ;;  %v4266_v62 = vadd.f32 %v4825_v44, %v4218_v1  ;;  %v4216_v13 = vadd.f32 %v7636_v55, %v4195_v38  ;;  %v4263_v11 = vadd.f32 %v4820_v49, %v4215_v30 }
 0x450   : > { %v4278_v22 = vmax.f32 %v4262_v19, 0.0  ;;  %v4282_v24 = vmax.f32 %v4266_v62, 0.0  ;;  %v4264_v31 = vadd.f32 %v4821_v53, %v4216_v13  ;;  %v4279_v59 = vmax.f32 %v4263_v11, 0.0 }
 0x452   : > { %v4854_v4 = vpack.c.bf16 %v4278_v22, %v4277_v52  ;;  %v4864_v27 = vpack.c.bf16 %v4282_v24, %v4281_v40  ;;  %v4280_v41 = vmax.f32 %v4264_v31, 0.0 }
 0x454   : > { %4878 = vst [vmem:[%s7360_s8 + $0x28] sm:$0xff] %v4854_v4   ;;  %4880 = vst [vmem:[%s7360_s8 + $0x38] sm:$0xff] %v4864_v27   ;;  %v4859_v55 = vpack.c.bf16 %v4280_v41, %v4279_v59 }
 0x456   : > { %4879 = vst [vmem:[%s7360_s8 + $0x30] sm:$0xff] %v4859_v55  }
 0x457   : > { %6436 = shalt.err (!%p6433_p12)
}
 0x458   : > { %s6437_s23 = scalar_lea.hbm %s7811_s30, 1024  ;;  %s6441_s13 = scalar_lea.hbm %s8034_s28, 4096 }
 0x459   : > { %p6438_p2 = scmp.ne.s32.totalorder %s7811_s30, %s6437_s23  ;;  %p6442_p1 = scmp.lt.u32.totalorder %s7811_s30, %s8034_s28 }
 0x45a   : > { %p6443_p4 = scmp.lt.u32.totalorder %s6441_s13, %s6437_s23  ;;  %p6445_p7 = scmp.lt.u32.totalorder %s6437_s23, %s7811_s30 }
 0x45b   : > { %p6439_p6 = pnand %p6438_p2, %p8035_p13 }
 0x45c   : > { %p6444_p3 = por %p6443_p4, %p6442_p1 }
 0x45d   : > { %p6440_p10 = pneg %p6439_p6 }
 0x45e   : > { %p6446_p9 = por %p6445_p7, %p6444_p3 }
 0x460   : > { %p6447_p11 = pnand %p6446_p9, %p6440_p10 }
 0x462   : > { %6450 = shalt.err (!%p6447_p11)
}
 0x463   : > { %s6559_s29 = smov 64   ;;  %s6560_s21 = smov 4  }
 0x464   : > { %6044 = dma.vmem_to_hbm [thread:$0]  (%p8035_p13), %s7813_s18, 1024, %s7811_s30, %s7820_s15, %s6559_s29, %s6559_s29, %s6560_s21  }
 0x465 PF: > { %s8036_s22 = sld [smem:[#allocation13_spill]]  ;;  %s8037_s27 = sld [smem:[#allocation15_spill]] }
 0x466   : > { %p6066_p0 = scmp.ge.s32.totalorder %s6549_s25, 2 }
 0x46b   : > { %s4395_s7 = sand.u32 1, %s8036_s22   ;;  %p8038_p5 = scmp.ne.s32.totalorder %s8037_s27, 0 }
 0x46c   : > { %s4396_s9 = scalar_lea.sflag [#allocation5], %s4395_s7 }
 0x46d   : > { %p6058_p8 = pnand %p6066_p0, %p8038_p5 }
 0x46f   : > { %6504 = dma.done.wait (!%p6058_p8), %s4396_s9, 1024  }
 0x470   : > { %6506 = vsyncadd (!%p6058_p8), %s4396_s9, 4294966272  ;;  %s21_s25 = sadd.s32 1, %s6549_s25   ;;  %s8039_s21 = sld [smem:[#allocation14_spill]] }
 0x471   : > { %p18_p12 = scmp.ge.s32.totalorder %s21_s25, 6   ;;  %s8040_s23 = sld [smem:[#allocation16_spill]] }
 0x472   : > { %s8041_s15 = smov %s6513_s16  ;;  %s8042_s16 = smov %s6517_s17 }
 0x473   : > { %s8043_s17 = smov %s6767_s2  ;;  %s8044_s18 = smov %s6525_s19 }
 0x474   : > { %s8045_s19 = smov %s6529_s20  ;;  %s8046_s20 = smov %s6762_s14 }
 0x475   : > { %s8047_s22 = smov %s6545_s24  ;;  %s8048_s24 = smov %s8054_s10 }
 0x476   :  { %20 = sbr.rel (!%p18_p12) target bundleno = 14 (0xe), region = 119 }
 0x47d   :  { %4401 = vsyncpa [#allocation4], 1 }
 0x47e   :  { %4403 = vsyncpa [#allocation4 + $0x1], 1 }
 0x47f   :  { %4404 = vsyncpa [#allocation7], 1 }
 0x480   :  { %4405 = vsyncpa [#allocation5], 1 }
 0x481   :  { %4407 = vsyncpa [#allocation5 + $0x1], 1 }

</bundles_post_ra>
